<compile_context>
chip_gen: v5e
topology: v5e:2x2
jax: 0.10.0
libtpu: 0.0.40
codegen_flags: <defaults>
</compile_context>

<pallas_src>
import functools

import jax
import jax.numpy as jnp
from jax.experimental import pallas as pl
from jax.experimental.pallas import tpu as pltpu


# ----------------------------------------------------------------------------
# Single fused Pallas kernel: 2x weight-shared LSTM recurrence + fuse + head
# ----------------------------------------------------------------------------
def fused_forward_kernel(x1_ref, x2_ref, wih_ref, whh_ref, b_lstm_ref,
                         w_f1_ref, w_f2_ref, b_f_ref,
                         w_h_ref, b_h_ref,
                         o_ref, *, T, B):
    """x1_ref/x2_ref: (T*B, I) time-major rows of the two sequence inputs.
    Output o_ref: (B, O) = head(relu(fuse(h_n_1, h_n_2)))."""
    H = whh_ref.shape[0]
    B2 = 2 * B

    # ---- one-time weight prep (off the serial critical path) ---------------
    # Double the g-gate columns so a single sigmoid over the full 4H lanes can
    # serve all gates: tanh(g) = 2*sigmoid(2g) - 1.
    col = jax.lax.broadcasted_iota(jnp.int32, (1, 4 * H), 1)
    g_scale = jnp.where((col >= 2 * H) & (col < 3 * H), 2.0, 1.0).astype(jnp.float32)

    wih = (wih_ref[...] * g_scale).astype(jnp.bfloat16)     # (I, 4H)
    whh = (whh_ref[...] * g_scale).astype(jnp.bfloat16)     # (H, 4H)
    b = b_lstm_ref[...] * g_scale                            # (1, 4H), f32

    # ---- hoisted input projections for ALL timesteps (both sequences) ------
    xz1 = jnp.dot(x1_ref[...].astype(jnp.bfloat16), wih,
                  preferred_element_type=jnp.float32) + b    # (T*B, 4H)
    xz2 = jnp.dot(x2_ref[...].astype(jnp.bfloat16), wih,
                  preferred_element_type=jnp.float32) + b    # (T*B, 4H)

    h = jnp.zeros((B2, H), jnp.float32)
    c = jnp.zeros((B2, H), jnp.float32)

    # T is a tiny static trip count -> fully unrolled; every slice is static.
    for t in range(T):
        hz = jnp.dot(h.astype(jnp.bfloat16), whh,
                     preferred_element_type=jnp.float32)     # (2B, 4H)
        z = jnp.concatenate(
            [xz1[t * B:(t + 1) * B, :], xz2[t * B:(t + 1) * B, :]],
            axis=0) + hz                                     # (2B, 4H)

        # Single full-width sigmoid; gate order i, f, g, o as in nn.LSTM.
        sig = jax.nn.sigmoid(z)                              # f32
        i_g = sig[:, 0 * H:1 * H]
        f_g = sig[:, 1 * H:2 * H]
        g_g = 2.0 * sig[:, 2 * H:3 * H] - 1.0                # tanh via sigmoid
        o_g = sig[:, 3 * H:4 * H]
        c = f_g * c + i_g * g_g
        h = o_g * jnp.tanh(c)

    # ---- epilogue: fuse (Linear over concat(h1, h2) + ReLU) then head ------
    h_bf = h.astype(jnp.bfloat16)
    h1 = h_bf[:B, :]          # h_n of sequence input 1
    h2 = h_bf[B:, :]          # h_n of sequence input 2
    z_f = (jnp.dot(h1, w_f1_ref[...].astype(jnp.bfloat16),
                   preferred_element_type=jnp.float32)
           + jnp.dot(h2, w_f2_ref[...].astype(jnp.bfloat16),
                     preferred_element_type=jnp.float32)
           + b_f_ref[...])
    z_f = jnp.maximum(z_f, 0.0)
    o_ref[...] = (jnp.dot(z_f.astype(jnp.bfloat16),
                          w_h_ref[...].astype(jnp.bfloat16),
                          preferred_element_type=jnp.float32)
                  + b_h_ref[...])


def forward_fused_pallas(x1, x2, params):
    """Full forward pass: [x1, x2] (each (T, B, I)) -> (1, B, O)."""
    T, B, I = x1.shape
    O = params['w_h'].shape[1]

    # Contiguous reshape only (no concat / no extra HBM round trip).
    x1_2d = x1.reshape(T * B, I)
    x2_2d = x2.reshape(T * B, I)

    vmem = pl.BlockSpec(memory_space=pltpu.MemorySpace.VMEM)

    out = pl.pallas_call(
        functools.partial(fused_forward_kernel, T=T, B=B),
        out_shape=jax.ShapeDtypeStruct((B, O), jnp.float32),
        in_specs=[vmem] * 10,
        out_specs=vmem,
    )(x1_2d, x2_2d,
      params['wih'], params['whh'], params['b_lstm'],
      params['w_f1'], params['w_f2'], params['b_f'],
      params['w_h'], params['b_h'])
    return out[None]                       # (1, B, O), matching the driver
    # TODO(synk): if B/T ever grow large, add a leading 'parallel' grid axis
    # over batch rows (v7x dual-TC) and tile the hoisted xz buffers over T.


# ----------------------------------------------------------------------------
# Pure-JAX reference: faithful transliteration of the PyTorch Forward driver
# ----------------------------------------------------------------------------
class ForwardRef:
    def __init__(self, module_dict, order):
        self.module_dict = module_dict
        self.order = order

    def __call__(self, inputs):
        outputs = {}
        if isinstance(inputs, list):
            if 'sequence' in self.order[0]:
                inputs, outputs = self.handle_sequence(inputs, outputs)
        for task in self.order:
            if isinstance(task, dict):
                if 'sequence' in task:
                    continue
            else:
                module = self.module_dict[task]
                outputs[task] = module(*inputs)
                inputs = [outputs[task]]
        return inputs[0]

    def handle_sequence(self, inputs, outputs):
        sequence = self.order[0]['sequence']
        for i, input_data in enumerate(inputs):
            sequence_inputs = input_data
            for seg in sequence:
                module = self.module_dict[seg]
                if 'lstm' in seg.lower():
                    sequence_outputs = self.lstm_return(
                        module, sequence_inputs, return_type='hidden_state')
                else:
                    sequence_outputs = module(sequence_inputs)
                outputs[seg + '_input_' + str(i)] = sequence_outputs
                sequence_inputs = sequence_outputs
            inputs[i] = sequence_inputs
        return (inputs, outputs)

    def lstm_return(self, layer, input, return_type=None):
        if return_type == 'hidden_state':
            _, (h_n, _) = layer(input)
            return h_n
        else:
            output, (h_n, c_n) = layer(input)
            return output


def lstm_ref(x, wih, whh, b):
    """nn.LSTM-like: x (T, B, I) -> (output (T,B,H), (h_n (1,B,H), c_n))."""
    T, B, _ = x.shape
    H = whh.shape[0]
    h = jnp.zeros((B, H), jnp.float32)
    c = jnp.zeros((B, H), jnp.float32)
    outs = []
    for t in range(T):
        z = x[t] @ wih + h @ whh + b
        i_g = jax.nn.sigmoid(z[:, :H])
        f_g = jax.nn.sigmoid(z[:, H:2 * H])
        g_g = jnp.tanh(z[:, 2 * H:3 * H])
        o_g = jax.nn.sigmoid(z[:, 3 * H:])
        c = f_g * c + i_g * g_g
        h = o_g * jnp.tanh(c)
        outs.append(h)
    return jnp.stack(outs, 0), (h[None], c[None])


def fuse_ref(h1, h2, w1, w2, b):
    return jnp.maximum(h1 @ w1 + h2 @ w2 + b, 0.0)


def linear_ref(x, w, b):
    return x @ w + b


# ----------------------------------------------------------------------------
if __name__ == "__main__":
    T, B, I, H, H2, O = 8, 8, 16, 32, 32, 16

    key = jax.random.PRNGKey(0)
    ks = jax.random.split(key, 10)

    params = {
        'wih':    0.1 * jax.random.normal(ks[0], (I, 4 * H), jnp.float32),
        'whh':    0.1 * jax.random.normal(ks[1], (H, 4 * H), jnp.float32),
        'b_lstm': 0.1 * jax.random.normal(ks[2], (1, 4 * H), jnp.float32),
        'w_f1':   0.1 * jax.random.normal(ks[3], (H, H2), jnp.float32),
        'w_f2':   0.1 * jax.random.normal(ks[4], (H, H2), jnp.float32),
        'b_f':    0.1 * jax.random.normal(ks[5], (1, H2), jnp.float32),
        'w_h':    0.1 * jax.random.normal(ks[6], (H2, O), jnp.float32),
        'b_h':    0.1 * jax.random.normal(ks[7], (1, O), jnp.float32),
    }

    x1 = jax.random.normal(ks[8], (T, B, I), jnp.float32)
    x2 = jax.random.normal(ks[9], (T, B, I), jnp.float32)

    # Fused Pallas forward (single no-grid pallas_call for the whole pipeline).
    fused = jax.jit(forward_fused_pallas)
    out = jax.block_until_ready(fused(x1, x2, params))

    # Reference: exact transliteration of the PyTorch Forward control flow.
    module_dict_ref = {
        'lstm_enc': functools.partial(lstm_ref, wih=params['wih'],
                                      whh=params['whh'], b=params['b_lstm']),
        'fuse': functools.partial(fuse_ref, w1=params['w_f1'],
                                  w2=params['w_f2'], b=params['b_f']),
        'head': functools.partial(linear_ref, w=params['w_h'],
                                  b=params['b_h']),
    }
    order = [{'sequence': ['lstm_enc']}, 'fuse', 'head']
    ref = jax.block_until_ready(ForwardRef(module_dict_ref, order)([x1, x2]))

    assert out.shape == (1, B, O), out.shape
    # bf16 single-pass MXU vs pure-f32 reference -> relaxed tolerance.
    assert jnp.allclose(out, ref, rtol=2e-2, atol=2e-2), \
        float(jnp.max(jnp.abs(out - ref)))

    print("KERNEL_OK")
</pallas_src>

<mosaic_0001>
module attributes {stable_mosaic.version = 11 : i64} {
  func.func @fused_forward_kernel(%arg0: memref<64x16xf32, #tpu.memory_space<vmem>>, %arg1: memref<64x16xf32, #tpu.memory_space<vmem>>, %arg2: memref<16x128xf32, #tpu.memory_space<vmem>>, %arg3: memref<32x128xf32, #tpu.memory_space<vmem>>, %arg4: memref<1x128xf32, #tpu.memory_space<vmem>>, %arg5: memref<32x32xf32, #tpu.memory_space<vmem>>, %arg6: memref<32x32xf32, #tpu.memory_space<vmem>>, %arg7: memref<1x32xf32, #tpu.memory_space<vmem>>, %arg8: memref<32x16xf32, #tpu.memory_space<vmem>>, %arg9: memref<1x16xf32, #tpu.memory_space<vmem>>, %arg10: memref<8x16xf32, #tpu.memory_space<vmem>>) attributes {dimension_semantics = [], scalar_prefetch = 0 : i64, scratch_operands = 0 : i64, tpu.core_type = #tpu.core_type<tc>} {
    %0 = tpu.iota {dimensions = array<i32: 1>} : vector<1x128xi32>
    %c64_i32 = arith.constant 64 : i32
    %1 = vector.broadcast %c64_i32 : i32 to vector<1x128xi32>
    %2 = arith.cmpi sge, %0, %1 : vector<1x128xi32>
    %c96_i32 = arith.constant 96 : i32
    %3 = vector.broadcast %c96_i32 : i32 to vector<1x128xi32>
    %4 = arith.cmpi slt, %0, %3 : vector<1x128xi32>
    %5 = arith.andi %2, %4 : vector<1x128xi1>
    %cst = arith.constant 2.000000e+00 : f32
    %cst_0 = arith.constant 1.000000e+00 : f32
    %6 = vector.broadcast %cst : f32 to vector<1x128xf32>
    %7 = vector.broadcast %cst_0 : f32 to vector<1x128xf32>
    %8 = arith.select %5, %6, %7 : vector<1x128xi1>, vector<1x128xf32>
    %c0 = arith.constant 0 : index
    %c0_1 = arith.constant 0 : index
    %9 = vector.load %arg2[%c0, %c0_1] : memref<16x128xf32, #tpu.memory_space<vmem>>, vector<16x128xf32>
    %10 = vector.broadcast %8 : vector<1x128xf32> to vector<16x128xf32>
    %11 = arith.mulf %9, %10 : vector<16x128xf32>
    %12 = arith.truncf %11 : vector<16x128xf32> to vector<16x128xbf16>
    %c0_2 = arith.constant 0 : index
    %c0_3 = arith.constant 0 : index
    %13 = vector.load %arg3[%c0_2, %c0_3] : memref<32x128xf32, #tpu.memory_space<vmem>>, vector<32x128xf32>
    %14 = vector.broadcast %8 : vector<1x128xf32> to vector<32x128xf32>
    %15 = arith.mulf %13, %14 : vector<32x128xf32>
    %16 = arith.truncf %15 : vector<32x128xf32> to vector<32x128xbf16>
    %c0_4 = arith.constant 0 : index
    %c0_5 = arith.constant 0 : index
    %17 = vector.load %arg4[%c0_4, %c0_5] : memref<1x128xf32, #tpu.memory_space<vmem>>, vector<1x128xf32>
    %18 = arith.mulf %17, %8 : vector<1x128xf32>
    %c0_6 = arith.constant 0 : index
    %c0_7 = arith.constant 0 : index
    %19 = vector.load %arg0[%c0_6, %c0_7] : memref<64x16xf32, #tpu.memory_space<vmem>>, vector<64x16xf32>
    %20 = arith.truncf %19 : vector<64x16xf32> to vector<64x16xbf16>
    %cst_8 = arith.constant dense<0.000000e+00> : vector<64x128xf32>
    %21 = tpu.matmul %20, %12, %cst_8 {dimension_numbers = #tpu.dot_dimension_numbers<[1], [0], [0], [1], [0, 0, 1, 1], [], []>} : vector<64x16xbf16>, vector<16x128xbf16>, vector<64x128xf32> -> vector<64x128xf32>
    %22 = vector.broadcast %18 : vector<1x128xf32> to vector<64x128xf32>
    %23 = arith.addf %21, %22 : vector<64x128xf32>
    %c0_9 = arith.constant 0 : index
    %c0_10 = arith.constant 0 : index
    %24 = vector.load %arg1[%c0_9, %c0_10] : memref<64x16xf32, #tpu.memory_space<vmem>>, vector<64x16xf32>
    %25 = arith.truncf %24 : vector<64x16xf32> to vector<64x16xbf16>
    %cst_11 = arith.constant dense<0.000000e+00> : vector<64x128xf32>
    %26 = tpu.matmul %25, %12, %cst_11 {dimension_numbers = #tpu.dot_dimension_numbers<[1], [0], [0], [1], [0, 0, 1, 1], [], []>} : vector<64x16xbf16>, vector<16x128xbf16>, vector<64x128xf32> -> vector<64x128xf32>
    %27 = vector.broadcast %18 : vector<1x128xf32> to vector<64x128xf32>
    %28 = arith.addf %26, %27 : vector<64x128xf32>
    %cst_12 = arith.constant 0.000000e+00 : f32
    %29 = vector.broadcast %cst_12 : f32 to vector<16x32xf32>
    %cst_13 = arith.constant 0.000000e+00 : f32
    %30 = vector.broadcast %cst_13 : f32 to vector<16x32xf32>
    %31 = arith.truncf %29 : vector<16x32xf32> to vector<16x32xbf16>
    %cst_14 = arith.constant dense<0.000000e+00> : vector<16x128xf32>
    %32 = tpu.matmul %31, %16, %cst_14 {dimension_numbers = #tpu.dot_dimension_numbers<[1], [0], [0], [1], [0, 0, 1, 1], [], []>} : vector<16x32xbf16>, vector<32x128xbf16>, vector<16x128xf32> -> vector<16x128xf32>
    %33 = vector.extract_strided_slice %23 {offsets = [0, 0], sizes = [8, 128], strides = [1, 1]} : vector<64x128xf32> to vector<8x128xf32>
    %34 = vector.extract_strided_slice %28 {offsets = [0, 0], sizes = [8, 128], strides = [1, 1]} : vector<64x128xf32> to vector<8x128xf32>
    %35 = tpu.concatenate %33, %34 in 0 : vector<8x128xf32>, vector<8x128xf32> -> vector<16x128xf32>
    %36 = arith.addf %35, %32 : vector<16x128xf32>
    %37 = arith.negf %36 : vector<16x128xf32>
    %38 = math.exp %37 : vector<16x128xf32>
    %cst_15 = arith.constant 1.000000e+00 : f32
    %39 = vector.broadcast %cst_15 : f32 to vector<16x128xf32>
    %40 = arith.addf %39, %38 : vector<16x128xf32>
    %41 = arith.divf %39, %40 : vector<16x128xf32>
    %42 = vector.extract_strided_slice %41 {offsets = [0, 0], sizes = [16, 32], strides = [1, 1]} : vector<16x128xf32> to vector<16x32xf32>
    %43 = vector.extract_strided_slice %41 {offsets = [0, 32], sizes = [16, 32], strides = [1, 1]} : vector<16x128xf32> to vector<16x32xf32>
    %44 = vector.extract_strided_slice %41 {offsets = [0, 64], sizes = [16, 32], strides = [1, 1]} : vector<16x128xf32> to vector<16x32xf32>
    %cst_16 = arith.constant 2.000000e+00 : f32
    %45 = vector.broadcast %cst_16 : f32 to vector<16x32xf32>
    %46 = arith.mulf %45, %44 : vector<16x32xf32>
    %cst_17 = arith.constant 1.000000e+00 : f32
    %47 = vector.broadcast %cst_17 : f32 to vector<16x32xf32>
    %48 = arith.subf %46, %47 : vector<16x32xf32>
    %49 = vector.extract_strided_slice %41 {offsets = [0, 96], sizes = [16, 32], strides = [1, 1]} : vector<16x128xf32> to vector<16x32xf32>
    %50 = arith.mulf %43, %30 : vector<16x32xf32>
    %51 = arith.mulf %42, %48 : vector<16x32xf32>
    %52 = arith.addf %50, %51 : vector<16x32xf32>
    %53 = math.tanh %52 : vector<16x32xf32>
    %54 = arith.mulf %49, %53 : vector<16x32xf32>
    %55 = arith.truncf %54 : vector<16x32xf32> to vector<16x32xbf16>
    %cst_18 = arith.constant dense<0.000000e+00> : vector<16x128xf32>
    %56 = tpu.matmul %55, %16, %cst_18 {dimension_numbers = #tpu.dot_dimension_numbers<[1], [0], [0], [1], [0, 0, 1, 1], [], []>} : vector<16x32xbf16>, vector<32x128xbf16>, vector<16x128xf32> -> vector<16x128xf32>
    %57 = vector.extract_strided_slice %23 {offsets = [8, 0], sizes = [8, 128], strides = [1, 1]} : vector<64x128xf32> to vector<8x128xf32>
    %58 = vector.extract_strided_slice %28 {offsets = [8, 0], sizes = [8, 128], strides = [1, 1]} : vector<64x128xf32> to vector<8x128xf32>
    %59 = tpu.concatenate %57, %58 in 0 : vector<8x128xf32>, vector<8x128xf32> -> vector<16x128xf32>
    %60 = arith.addf %59, %56 : vector<16x128xf32>
    %61 = arith.negf %60 : vector<16x128xf32>
    %62 = math.exp %61 : vector<16x128xf32>
    %cst_19 = arith.constant 1.000000e+00 : f32
    %63 = vector.broadcast %cst_19 : f32 to vector<16x128xf32>
    %64 = arith.addf %63, %62 : vector<16x128xf32>
    %65 = arith.divf %63, %64 : vector<16x128xf32>
    %66 = vector.extract_strided_slice %65 {offsets = [0, 0], sizes = [16, 32], strides = [1, 1]} : vector<16x128xf32> to vector<16x32xf32>
    %67 = vector.extract_strided_slice %65 {offsets = [0, 32], sizes = [16, 32], strides = [1, 1]} : vector<16x128xf32> to vector<16x32xf32>
    %68 = vector.extract_strided_slice %65 {offsets = [0, 64], sizes = [16, 32], strides = [1, 1]} : vector<16x128xf32> to vector<16x32xf32>
    %cst_20 = arith.constant 2.000000e+00 : f32
    %69 = vector.broadcast %cst_20 : f32 to vector<16x32xf32>
    %70 = arith.mulf %69, %68 : vector<16x32xf32>
    %cst_21 = arith.constant 1.000000e+00 : f32
    %71 = vector.broadcast %cst_21 : f32 to vector<16x32xf32>
    %72 = arith.subf %70, %71 : vector<16x32xf32>
    %73 = vector.extract_strided_slice %65 {offsets = [0, 96], sizes = [16, 32], strides = [1, 1]} : vector<16x128xf32> to vector<16x32xf32>
    %74 = arith.mulf %67, %52 : vector<16x32xf32>
    %75 = arith.mulf %66, %72 : vector<16x32xf32>
    %76 = arith.addf %74, %75 : vector<16x32xf32>
    %77 = math.tanh %76 : vector<16x32xf32>
    %78 = arith.mulf %73, %77 : vector<16x32xf32>
    %79 = arith.truncf %78 : vector<16x32xf32> to vector<16x32xbf16>
    %cst_22 = arith.constant dense<0.000000e+00> : vector<16x128xf32>
    %80 = tpu.matmul %79, %16, %cst_22 {dimension_numbers = #tpu.dot_dimension_numbers<[1], [0], [0], [1], [0, 0, 1, 1], [], []>} : vector<16x32xbf16>, vector<32x128xbf16>, vector<16x128xf32> -> vector<16x128xf32>
    %81 = vector.extract_strided_slice %23 {offsets = [16, 0], sizes = [8, 128], strides = [1, 1]} : vector<64x128xf32> to vector<8x128xf32>
    %82 = vector.extract_strided_slice %28 {offsets = [16, 0], sizes = [8, 128], strides = [1, 1]} : vector<64x128xf32> to vector<8x128xf32>
    %83 = tpu.concatenate %81, %82 in 0 : vector<8x128xf32>, vector<8x128xf32> -> vector<16x128xf32>
    %84 = arith.addf %83, %80 : vector<16x128xf32>
    %85 = arith.negf %84 : vector<16x128xf32>
    %86 = math.exp %85 : vector<16x128xf32>
    %cst_23 = arith.constant 1.000000e+00 : f32
    %87 = vector.broadcast %cst_23 : f32 to vector<16x128xf32>
    %88 = arith.addf %87, %86 : vector<16x128xf32>
    %89 = arith.divf %87, %88 : vector<16x128xf32>
    %90 = vector.extract_strided_slice %89 {offsets = [0, 0], sizes = [16, 32], strides = [1, 1]} : vector<16x128xf32> to vector<16x32xf32>
    %91 = vector.extract_strided_slice %89 {offsets = [0, 32], sizes = [16, 32], strides = [1, 1]} : vector<16x128xf32> to vector<16x32xf32>
    %92 = vector.extract_strided_slice %89 {offsets = [0, 64], sizes = [16, 32], strides = [1, 1]} : vector<16x128xf32> to vector<16x32xf32>
    %cst_24 = arith.constant 2.000000e+00 : f32
    %93 = vector.broadcast %cst_24 : f32 to vector<16x32xf32>
    %94 = arith.mulf %93, %92 : vector<16x32xf32>
    %cst_25 = arith.constant 1.000000e+00 : f32
    %95 = vector.broadcast %cst_25 : f32 to vector<16x32xf32>
    %96 = arith.subf %94, %95 : vector<16x32xf32>
    %97 = vector.extract_strided_slice %89 {offsets = [0, 96], sizes = [16, 32], strides = [1, 1]} : vector<16x128xf32> to vector<16x32xf32>
    %98 = arith.mulf %91, %76 : vector<16x32xf32>
    %99 = arith.mulf %90, %96 : vector<16x32xf32>
    %100 = arith.addf %98, %99 : vector<16x32xf32>
    %101 = math.tanh %100 : vector<16x32xf32>
    %102 = arith.mulf %97, %101 : vector<16x32xf32>
    %103 = arith.truncf %102 : vector<16x32xf32> to vector<16x32xbf16>
    %cst_26 = arith.constant dense<0.000000e+00> : vector<16x128xf32>
    %104 = tpu.matmul %103, %16, %cst_26 {dimension_numbers = #tpu.dot_dimension_numbers<[1], [0], [0], [1], [0, 0, 1, 1], [], []>} : vector<16x32xbf16>, vector<32x128xbf16>, vector<16x128xf32> -> vector<16x128xf32>
    %105 = vector.extract_strided_slice %23 {offsets = [24, 0], sizes = [8, 128], strides = [1, 1]} : vector<64x128xf32> to vector<8x128xf32>
    %106 = vector.extract_strided_slice %28 {offsets = [24, 0], sizes = [8, 128], strides = [1, 1]} : vector<64x128xf32> to vector<8x128xf32>
    %107 = tpu.concatenate %105, %106 in 0 : vector<8x128xf32>, vector<8x128xf32> -> vector<16x128xf32>
    %108 = arith.addf %107, %104 : vector<16x128xf32>
    %109 = arith.negf %108 : vector<16x128xf32>
    %110 = math.exp %109 : vector<16x128xf32>
    %cst_27 = arith.constant 1.000000e+00 : f32
    %111 = vector.broadcast %cst_27 : f32 to vector<16x128xf32>
    %112 = arith.addf %111, %110 : vector<16x128xf32>
    %113 = arith.divf %111, %112 : vector<16x128xf32>
    %114 = vector.extract_strided_slice %113 {offsets = [0, 0], sizes = [16, 32], strides = [1, 1]} : vector<16x128xf32> to vector<16x32xf32>
    %115 = vector.extract_strided_slice %113 {offsets = [0, 32], sizes = [16, 32], strides = [1, 1]} : vector<16x128xf32> to vector<16x32xf32>
    %116 = vector.extract_strided_slice %113 {offsets = [0, 64], sizes = [16, 32], strides = [1, 1]} : vector<16x128xf32> to vector<16x32xf32>
    %cst_28 = arith.constant 2.000000e+00 : f32
    %117 = vector.broadcast %cst_28 : f32 to vector<16x32xf32>
    %118 = arith.mulf %117, %116 : vector<16x32xf32>
    %cst_29 = arith.constant 1.000000e+00 : f32
    %119 = vector.broadcast %cst_29 : f32 to vector<16x32xf32>
    %120 = arith.subf %118, %119 : vector<16x32xf32>
    %121 = vector.extract_strided_slice %113 {offsets = [0, 96], sizes = [16, 32], strides = [1, 1]} : vector<16x128xf32> to vector<16x32xf32>
    %122 = arith.mulf %115, %100 : vector<16x32xf32>
    %123 = arith.mulf %114, %120 : vector<16x32xf32>
    %124 = arith.addf %122, %123 : vector<16x32xf32>
    %125 = math.tanh %124 : vector<16x32xf32>
    %126 = arith.mulf %121, %125 : vector<16x32xf32>
    %127 = arith.truncf %126 : vector<16x32xf32> to vector<16x32xbf16>
    %cst_30 = arith.constant dense<0.000000e+00> : vector<16x128xf32>
    %128 = tpu.matmul %127, %16, %cst_30 {dimension_numbers = #tpu.dot_dimension_numbers<[1], [0], [0], [1], [0, 0, 1, 1], [], []>} : vector<16x32xbf16>, vector<32x128xbf16>, vector<16x128xf32> -> vector<16x128xf32>
    %129 = vector.extract_strided_slice %23 {offsets = [32, 0], sizes = [8, 128], strides = [1, 1]} : vector<64x128xf32> to vector<8x128xf32>
    %130 = vector.extract_strided_slice %28 {offsets = [32, 0], sizes = [8, 128], strides = [1, 1]} : vector<64x128xf32> to vector<8x128xf32>
    %131 = tpu.concatenate %129, %130 in 0 : vector<8x128xf32>, vector<8x128xf32> -> vector<16x128xf32>
    %132 = arith.addf %131, %128 : vector<16x128xf32>
    %133 = arith.negf %132 : vector<16x128xf32>
    %134 = math.exp %133 : vector<16x128xf32>
    %cst_31 = arith.constant 1.000000e+00 : f32
    %135 = vector.broadcast %cst_31 : f32 to vector<16x128xf32>
    %136 = arith.addf %135, %134 : vector<16x128xf32>
    %137 = arith.divf %135, %136 : vector<16x128xf32>
    %138 = vector.extract_strided_slice %137 {offsets = [0, 0], sizes = [16, 32], strides = [1, 1]} : vector<16x128xf32> to vector<16x32xf32>
    %139 = vector.extract_strided_slice %137 {offsets = [0, 32], sizes = [16, 32], strides = [1, 1]} : vector<16x128xf32> to vector<16x32xf32>
    %140 = vector.extract_strided_slice %137 {offsets = [0, 64], sizes = [16, 32], strides = [1, 1]} : vector<16x128xf32> to vector<16x32xf32>
    %cst_32 = arith.constant 2.000000e+00 : f32
    %141 = vector.broadcast %cst_32 : f32 to vector<16x32xf32>
    %142 = arith.mulf %141, %140 : vector<16x32xf32>
    %cst_33 = arith.constant 1.000000e+00 : f32
    %143 = vector.broadcast %cst_33 : f32 to vector<16x32xf32>
    %144 = arith.subf %142, %143 : vector<16x32xf32>
    %145 = vector.extract_strided_slice %137 {offsets = [0, 96], sizes = [16, 32], strides = [1, 1]} : vector<16x128xf32> to vector<16x32xf32>
    %146 = arith.mulf %139, %124 : vector<16x32xf32>
    %147 = arith.mulf %138, %144 : vector<16x32xf32>
    %148 = arith.addf %146, %147 : vector<16x32xf32>
    %149 = math.tanh %148 : vector<16x32xf32>
    %150 = arith.mulf %145, %149 : vector<16x32xf32>
    %151 = arith.truncf %150 : vector<16x32xf32> to vector<16x32xbf16>
    %cst_34 = arith.constant dense<0.000000e+00> : vector<16x128xf32>
    %152 = tpu.matmul %151, %16, %cst_34 {dimension_numbers = #tpu.dot_dimension_numbers<[1], [0], [0], [1], [0, 0, 1, 1], [], []>} : vector<16x32xbf16>, vector<32x128xbf16>, vector<16x128xf32> -> vector<16x128xf32>
    %153 = vector.extract_strided_slice %23 {offsets = [40, 0], sizes = [8, 128], strides = [1, 1]} : vector<64x128xf32> to vector<8x128xf32>
    %154 = vector.extract_strided_slice %28 {offsets = [40, 0], sizes = [8, 128], strides = [1, 1]} : vector<64x128xf32> to vector<8x128xf32>
    %155 = tpu.concatenate %153, %154 in 0 : vector<8x128xf32>, vector<8x128xf32> -> vector<16x128xf32>
    %156 = arith.addf %155, %152 : vector<16x128xf32>
    %157 = arith.negf %156 : vector<16x128xf32>
    %158 = math.exp %157 : vector<16x128xf32>
    %cst_35 = arith.constant 1.000000e+00 : f32
    %159 = vector.broadcast %cst_35 : f32 to vector<16x128xf32>
    %160 = arith.addf %159, %158 : vector<16x128xf32>
    %161 = arith.divf %159, %160 : vector<16x128xf32>
    %162 = vector.extract_strided_slice %161 {offsets = [0, 0], sizes = [16, 32], strides = [1, 1]} : vector<16x128xf32> to vector<16x32xf32>
    %163 = vector.extract_strided_slice %161 {offsets = [0, 32], sizes = [16, 32], strides = [1, 1]} : vector<16x128xf32> to vector<16x32xf32>
    %164 = vector.extract_strided_slice %161 {offsets = [0, 64], sizes = [16, 32], strides = [1, 1]} : vector<16x128xf32> to vector<16x32xf32>
    %cst_36 = arith.constant 2.000000e+00 : f32
    %165 = vector.broadcast %cst_36 : f32 to vector<16x32xf32>
    %166 = arith.mulf %165, %164 : vector<16x32xf32>
    %cst_37 = arith.constant 1.000000e+00 : f32
    %167 = vector.broadcast %cst_37 : f32 to vector<16x32xf32>
    %168 = arith.subf %166, %167 : vector<16x32xf32>
    %169 = vector.extract_strided_slice %161 {offsets = [0, 96], sizes = [16, 32], strides = [1, 1]} : vector<16x128xf32> to vector<16x32xf32>
    %170 = arith.mulf %163, %148 : vector<16x32xf32>
    %171 = arith.mulf %162, %168 : vector<16x32xf32>
    %172 = arith.addf %170, %171 : vector<16x32xf32>
    %173 = math.tanh %172 : vector<16x32xf32>
    %174 = arith.mulf %169, %173 : vector<16x32xf32>
    %175 = arith.truncf %174 : vector<16x32xf32> to vector<16x32xbf16>
    %cst_38 = arith.constant dense<0.000000e+00> : vector<16x128xf32>
    %176 = tpu.matmul %175, %16, %cst_38 {dimension_numbers = #tpu.dot_dimension_numbers<[1], [0], [0], [1], [0, 0, 1, 1], [], []>} : vector<16x32xbf16>, vector<32x128xbf16>, vector<16x128xf32> -> vector<16x128xf32>
    %177 = vector.extract_strided_slice %23 {offsets = [48, 0], sizes = [8, 128], strides = [1, 1]} : vector<64x128xf32> to vector<8x128xf32>
    %178 = vector.extract_strided_slice %28 {offsets = [48, 0], sizes = [8, 128], strides = [1, 1]} : vector<64x128xf32> to vector<8x128xf32>
    %179 = tpu.concatenate %177, %178 in 0 : vector<8x128xf32>, vector<8x128xf32> -> vector<16x128xf32>
    %180 = arith.addf %179, %176 : vector<16x128xf32>
    %181 = arith.negf %180 : vector<16x128xf32>
    %182 = math.exp %181 : vector<16x128xf32>
    %cst_39 = arith.constant 1.000000e+00 : f32
    %183 = vector.broadcast %cst_39 : f32 to vector<16x128xf32>
    %184 = arith.addf %183, %182 : vector<16x128xf32>
    %185 = arith.divf %183, %184 : vector<16x128xf32>
    %186 = vector.extract_strided_slice %185 {offsets = [0, 0], sizes = [16, 32], strides = [1, 1]} : vector<16x128xf32> to vector<16x32xf32>
    %187 = vector.extract_strided_slice %185 {offsets = [0, 32], sizes = [16, 32], strides = [1, 1]} : vector<16x128xf32> to vector<16x32xf32>
    %188 = vector.extract_strided_slice %185 {offsets = [0, 64], sizes = [16, 32], strides = [1, 1]} : vector<16x128xf32> to vector<16x32xf32>
    %cst_40 = arith.constant 2.000000e+00 : f32
    %189 = vector.broadcast %cst_40 : f32 to vector<16x32xf32>
    %190 = arith.mulf %189, %188 : vector<16x32xf32>
    %cst_41 = arith.constant 1.000000e+00 : f32
    %191 = vector.broadcast %cst_41 : f32 to vector<16x32xf32>
    %192 = arith.subf %190, %191 : vector<16x32xf32>
    %193 = vector.extract_strided_slice %185 {offsets = [0, 96], sizes = [16, 32], strides = [1, 1]} : vector<16x128xf32> to vector<16x32xf32>
    %194 = arith.mulf %187, %172 : vector<16x32xf32>
    %195 = arith.mulf %186, %192 : vector<16x32xf32>
    %196 = arith.addf %194, %195 : vector<16x32xf32>
    %197 = math.tanh %196 : vector<16x32xf32>
    %198 = arith.mulf %193, %197 : vector<16x32xf32>
    %199 = arith.truncf %198 : vector<16x32xf32> to vector<16x32xbf16>
    %cst_42 = arith.constant dense<0.000000e+00> : vector<16x128xf32>
    %200 = tpu.matmul %199, %16, %cst_42 {dimension_numbers = #tpu.dot_dimension_numbers<[1], [0], [0], [1], [0, 0, 1, 1], [], []>} : vector<16x32xbf16>, vector<32x128xbf16>, vector<16x128xf32> -> vector<16x128xf32>
    %201 = vector.extract_strided_slice %23 {offsets = [56, 0], sizes = [8, 128], strides = [1, 1]} : vector<64x128xf32> to vector<8x128xf32>
    %202 = vector.extract_strided_slice %28 {offsets = [56, 0], sizes = [8, 128], strides = [1, 1]} : vector<64x128xf32> to vector<8x128xf32>
    %203 = tpu.concatenate %201, %202 in 0 : vector<8x128xf32>, vector<8x128xf32> -> vector<16x128xf32>
    %204 = arith.addf %203, %200 : vector<16x128xf32>
    %205 = arith.negf %204 : vector<16x128xf32>
    %206 = math.exp %205 : vector<16x128xf32>
    %cst_43 = arith.constant 1.000000e+00 : f32
    %207 = vector.broadcast %cst_43 : f32 to vector<16x128xf32>
    %208 = arith.addf %207, %206 : vector<16x128xf32>
    %209 = arith.divf %207, %208 : vector<16x128xf32>
    %210 = vector.extract_strided_slice %209 {offsets = [0, 0], sizes = [16, 32], strides = [1, 1]} : vector<16x128xf32> to vector<16x32xf32>
    %211 = vector.extract_strided_slice %209 {offsets = [0, 32], sizes = [16, 32], strides = [1, 1]} : vector<16x128xf32> to vector<16x32xf32>
    %212 = vector.extract_strided_slice %209 {offsets = [0, 64], sizes = [16, 32], strides = [1, 1]} : vector<16x128xf32> to vector<16x32xf32>
    %cst_44 = arith.constant 2.000000e+00 : f32
    %213 = vector.broadcast %cst_44 : f32 to vector<16x32xf32>
    %214 = arith.mulf %213, %212 : vector<16x32xf32>
    %cst_45 = arith.constant 1.000000e+00 : f32
    %215 = vector.broadcast %cst_45 : f32 to vector<16x32xf32>
    %216 = arith.subf %214, %215 : vector<16x32xf32>
    %217 = vector.extract_strided_slice %209 {offsets = [0, 96], sizes = [16, 32], strides = [1, 1]} : vector<16x128xf32> to vector<16x32xf32>
    %218 = arith.mulf %211, %196 : vector<16x32xf32>
    %219 = arith.mulf %210, %216 : vector<16x32xf32>
    %220 = arith.addf %218, %219 : vector<16x32xf32>
    %221 = math.tanh %220 : vector<16x32xf32>
    %222 = arith.mulf %217, %221 : vector<16x32xf32>
    %223 = arith.truncf %222 : vector<16x32xf32> to vector<16x32xbf16>
    %224 = vector.extract_strided_slice %223 {offsets = [0, 0], sizes = [8, 32], strides = [1, 1]} : vector<16x32xbf16> to vector<8x32xbf16>
    %225 = vector.extract_strided_slice %223 {offsets = [8, 0], sizes = [8, 32], strides = [1, 1]} : vector<16x32xbf16> to vector<8x32xbf16>
    %c0_46 = arith.constant 0 : index
    %c0_47 = arith.constant 0 : index
    %226 = vector.load %arg5[%c0_46, %c0_47] : memref<32x32xf32, #tpu.memory_space<vmem>>, vector<32x32xf32>
    %227 = arith.truncf %226 : vector<32x32xf32> to vector<32x32xbf16>
    %cst_48 = arith.constant dense<0.000000e+00> : vector<8x32xf32>
    %228 = tpu.matmul %224, %227, %cst_48 {dimension_numbers = #tpu.dot_dimension_numbers<[1], [0], [0], [1], [0, 0, 1, 1], [], []>} : vector<8x32xbf16>, vector<32x32xbf16>, vector<8x32xf32> -> vector<8x32xf32>
    %c0_49 = arith.constant 0 : index
    %c0_50 = arith.constant 0 : index
    %229 = vector.load %arg6[%c0_49, %c0_50] : memref<32x32xf32, #tpu.memory_space<vmem>>, vector<32x32xf32>
    %230 = arith.truncf %229 : vector<32x32xf32> to vector<32x32xbf16>
    %cst_51 = arith.constant dense<0.000000e+00> : vector<8x32xf32>
    %231 = tpu.matmul %225, %230, %cst_51 {dimension_numbers = #tpu.dot_dimension_numbers<[1], [0], [0], [1], [0, 0, 1, 1], [], []>} : vector<8x32xbf16>, vector<32x32xbf16>, vector<8x32xf32> -> vector<8x32xf32>
    %232 = arith.addf %228, %231 : vector<8x32xf32>
    %c0_52 = arith.constant 0 : index
    %c0_53 = arith.constant 0 : index
    %233 = vector.load %arg7[%c0_52, %c0_53] : memref<1x32xf32, #tpu.memory_space<vmem>>, vector<1x32xf32>
    %234 = vector.broadcast %233 : vector<1x32xf32> to vector<8x32xf32>
    %235 = arith.addf %232, %234 : vector<8x32xf32>
    %cst_54 = arith.constant 0.000000e+00 : f32
    %236 = vector.broadcast %cst_54 : f32 to vector<8x32xf32>
    %237 = arith.maximumf %235, %236 : vector<8x32xf32>
    %238 = arith.truncf %237 : vector<8x32xf32> to vector<8x32xbf16>
    %c0_55 = arith.constant 0 : index
    %c0_56 = arith.constant 0 : index
    %239 = vector.load %arg8[%c0_55, %c0_56] : memref<32x16xf32, #tpu.memory_space<vmem>>, vector<32x16xf32>
    %240 = arith.truncf %239 : vector<32x16xf32> to vector<32x16xbf16>
    %cst_57 = arith.constant dense<0.000000e+00> : vector<8x16xf32>
    %241 = tpu.matmul %238, %240, %cst_57 {dimension_numbers = #tpu.dot_dimension_numbers<[1], [0], [0], [1], [0, 0, 1, 1], [], []>} : vector<8x32xbf16>, vector<32x16xbf16>, vector<8x16xf32> -> vector<8x16xf32>
    %c0_58 = arith.constant 0 : index
    %c0_59 = arith.constant 0 : index
    %242 = vector.load %arg9[%c0_58, %c0_59] : memref<1x16xf32, #tpu.memory_space<vmem>>, vector<1x16xf32>
    %243 = vector.broadcast %242 : vector<1x16xf32> to vector<8x16xf32>
    %244 = arith.addf %241, %243 : vector<8x16xf32>
    %c0_60 = arith.constant 0 : index
    %c0_61 = arith.constant 0 : index
    %245 = vector.load %arg10[%c0_60, %c0_61] : memref<8x16xf32, #tpu.memory_space<vmem>>, vector<8x16xf32>
    tpu.vector_store %arg10[%c0_60, %c0_61], %244 {strides = array<i32>} : memref<8x16xf32, #tpu.memory_space<vmem>>, vector<8x16xf32>,
    return
  }
}

</mosaic_0001>

<bundles_post_ra>
// kernel: forward_fused_pallas.1
= control target key start
LH: loop header
LB: loop body
LE: loop exit
PB: predicated region body
PF: predicated region fallthrough
CT: control target
= control target key end

     0   :  { %15 = vsyncpa [#allocation3], 0  ;;  %s1708_s0 = inlined_call_operand.hbm [shape: f32[64,16], index: 0, kind: input, shape index: {}]   ;;  %s1709_s1 = inlined_call_operand.hbm [shape: f32[64,16], index: 1, kind: input, shape index: {}]   ;;  %s1710_s2 = inlined_call_operand.vmem [shape: f32[16,128], index: 2, kind: input, shape index: {}]   ;;  %s1711_s3 = inlined_call_operand.vmem [shape: f32[32,128], index: 3, kind: input, shape index: {}]   ;;  %s1712_s4 = inlined_call_operand.vmem [shape: f32[1,128], index: 4, kind: input, shape index: {}]   ;;  %s1713_s5 = inlined_call_operand.hbm [shape: f32[32,32], index: 5, kind: input, shape index: {}]   ;;  %s1714_s6 = inlined_call_operand.hbm [shape: f32[32,32], index: 6, kind: input, shape index: {}]   ;;  %s1715_s7 = inlined_call_operand.vmem [shape: f32[1,32], index: 7, kind: input, shape index: {}]   ;;  %s1716_s8 = inlined_call_operand.vmem [shape: f32[32,16], index: 8, kind: input, shape index: {}]   ;;  %s1717_s9 = inlined_call_operand.vmem [shape: f32[1,16], index: 9, kind: input, shape index: {}]   ;;  %s1718_s10 = inlined_call_operand.hbm [shape: f32[8,16], index: 10, kind: output, shape index: {}]  }
   0x1   :  { %16 = vsyncpa [#allocation6], 0 }
   0x2   :  { %17 = vsyncpa [#allocation9], 0 }
   0x3   :  { %18 = vsyncpa [#allocation4], 0  ;;  %s36_s15 = sshll.u32 %s1709_s1, 4  ;;  %s1418_s16 = smov [#allocation5]   ;;  %s37_s15 = int_to_ptr.hbm [resolvable:$true] %s36_s15 }
   0x4   :  { %s38_s17 = sshll.u32 %s1418_s16, 4  ;;  %s23_s20 = sshll.u32 %s1708_s0, 4  ;;  %s39_s17 = int_to_ptr.vmem [resolvable:$true] %s38_s17  ;;  %s24_s20 = int_to_ptr.hbm [resolvable:$true] %s23_s20 }
   0x5   :  { %s1419_s21 = smov 128   ;;  %s1420_s22 = smov 8  }
   0x6   :  { %44 = dma.hbm_to_vmem [thread:$0]  %s37_s15, 1024, %s39_s17, [#allocation6], %s1419_s21, %s1419_s21, %s1420_s22  }
   0x7   :  { %s1421_s23 = smov [#allocation2]   ;;  %s55_s27 = sshll.u32 %s1713_s5, 4  ;;  %s56_s27 = int_to_ptr.hbm [resolvable:$true] %s55_s27 }
   0x8   :  { %s25_s24 = sshll.u32 %s1421_s23, 4  ;;  %s68_s29 = sshll.u32 %s1714_s6, 4  ;;  %s26_s24 = int_to_ptr.vmem [resolvable:$true] %s25_s24  ;;  %s69_s29 = int_to_ptr.hbm [resolvable:$true] %s68_s29 }
   0x9   :  { %31 = dma.hbm_to_vmem [thread:$0]  %s24_s20, 1024, %s26_s24, [#allocation3], %s1419_s21, %s1419_s21, %s1420_s22  }
   0xa   :  { %s1422_s30 = smov [#allocation7]   ;;  %s1423_s0 = smov [#allocation8]  }
   0xb   :  { %s57_s11 = sshll.u32 %s1422_s30, 4  ;;  %s70_s12 = sshll.u32 %s1423_s0, 4  ;;  %s58_s11 = int_to_ptr.vmem [resolvable:$true] %s57_s11  ;;  %s71_s12 = int_to_ptr.vmem [resolvable:$true] %s70_s12 }
   0xc   :  { %63 = dma.hbm_to_vmem [thread:$0]  %s56_s27, 512, %s58_s11, [#allocation6], %s1419_s21, %s1419_s21, %s1420_s22  }
   0xd   :  { %76 = dma.hbm_to_vmem [thread:$0]  %s69_s29, 512, %s71_s12, [#allocation9], %s1419_s21, %s1419_s21, %s1420_s22  }
   0xe   :  { %1410 = dma.done.wait [#allocation3], 1024  }
   0xf   :  { %1411 = vsyncadd [#allocation3], 4294966272 }
  0x10   :  { %1412 = dma.done.wait [#allocation6], 1536  }
  0x11   :  { %1413 = vsyncadd [#allocation6], 4294965760 }
  0x12   :  { %1414 = dma.done.wait [#allocation9], 512  }
  0x13   :  { %1415 = vsyncadd [#allocation9], 4294966784  ;;  %v100_v0 = vlaneseq  ;;  %v1424_v2 = vmov 1.0   ;;  %v106_v4 = vld [vmem:[%s1710_s2] sm:$0xff]  ;;  %v107_v5 = vld [vmem:[%s1710_s2 + $0x8] sm:$0xff]  ;;  %vm138_vm3 = vcmask 130048  }
  0x14   :  { %v111_v6 = vld [vmem:[%s1711_s3] sm:$0xff]  ;;  %v112_v9 = vld [vmem:[%s1711_s3 + $0x8] sm:$0xff]  ;;  %v113_v10 = vld [vmem:[%s1711_s3 + $0x10] sm:$0xff]  ;;  %v1425_v25 = vmov 0   ;;  %s1427_s23 = smov 32   ;;  %vm233_vm12 = vcmask 261120  }
  0x15   :  { %v101_v1 = vand.u32 127, %v100_v0  ;;  %v114_v11 = vld [vmem:[%s1711_s3 + $0x18] sm:$0xff]  ;;  %v123_v16 = vld [vmem:[#allocation2] sm:$0xff]  ;;  %v124_v17 = vld [vmem:[#allocation2 + $0x8] sm:$0xff]  ;;  %s1119_s15 = sshll.u32 %s1718_s10, 4  ;;  %s1120_s15 = int_to_ptr.hbm [resolvable:$true] %s1119_s15 }
  0x16   :  { %v180_v19 = vld [vmem:[#allocation5] sm:$0xff]  ;;  %v181_v20 = vld [vmem:[#allocation5 + $0x8] sm:$0xff]  ;;  %v131_v22 = vpack.c.bf16 %v124_v17, %v123_v16 }
  0x17   :  { %vm102_vm0 = vcmp.ge.s32.totalorder %v101_v1, 64  ;;  %vm103_vm1 = vcmp.lt.s32.totalorder %v101_v1, 96  ;;  %v188_v23 = vpack.c.bf16 %v181_v20, %v180_v19  ;;  %v121_v26 = vld [vmem:[%s1712_s4] sm:$0x1]  ;;  %s1426_s4 = smov 64  }
  0x18   :  { %vm104_vm2 = vmand %vm102_vm0, %vm103_vm1 }
  0x19   :  { %v105_v3 = vsel %vm104_vm2, 2.0, %v1424_v2 }
  0x1a   :  { %v108_v7 = vmul.f32 %v106_v4, %v105_v3  ;;  %v109_v8 = vmul.f32 %v107_v5, %v105_v3  ;;  %v115_v12 = vmul.f32 %v111_v6, %v105_v3  ;;  %v116_v13 = vmul.f32 %v112_v9, %v105_v3 }
  0x1b   :  { %v117_v14 = vmul.f32 %v113_v10, %v105_v3  ;;  %v118_v15 = vmul.f32 %v114_v11, %v105_v3  ;;  %v122_v27 = vmul.f32 %v121_v26, %v105_v3 }
  0x1c   :  { %v110_v18 = vpack.c.bf16 %v109_v8, %v108_v7  ;;  %v1516_v24 = vpack.c.bf16 %v116_v13, %v115_v12 }
  0x1d   :  { %v1514_v21 = vpack.c.bf16 %v118_v15, %v117_v14  ;;  %v1533_v28 = vperm.slane %v122_v27, 0 }
  0x1e   :  { %158 = vmatpush.bf16.msra.mxu0 %v110_v18  ;;  %211 = vmatpush.bf16.msra.mxu1 %v110_v18 }
  0x1f   :  { %243 = vmatpush.bf16.msra.mxu2 %v1514_v21  ;;  %342 = vmatpush.bf16.msra.mxu3 %v1514_v21 }
  0x21   :  { %1131 = vmatmul.msk.bf16.vlgmr.msra.gmra.mxu0 %vm138_vm3, %v131_v22  ;;  %1135 = vmatmul.msk.bf16.vlgmr.msra.gmra.mxu1 %vm138_vm3, %v188_v23 }
  0x23   :  { %244 = vmatpush.bf16.msra.mxu2 %v1516_v24  ;;  %343 = vmatpush.bf16.msra.mxu3 %v1516_v24 }
  0x26   :  { %245 = vmatmul.bf16.vlgmr.msra.gmra.mxu2 %v1425_v25 }
  0x27   :  { %441 = vmatpush.bf16.msrb.mxu2 %v1514_v21  ;;  %540 = vmatpush.bf16.msrb.mxu3 %v1514_v21 }
  0x2b   :  { %442 = vmatpush.bf16.msrb.mxu2 %v1516_v24  ;;  %541 = vmatpush.bf16.msrb.mxu3 %v1516_v24 }
  0x2f   :  { %639 = vmatpush.bf16.msra.mxu2 %v1514_v21 }
  0x33   :  { %640 = vmatpush.bf16.msra.mxu2 %v1516_v24 }
  0x9e   :  { %v160_v29 = vpop.f32.mrf.mxu0  ;;  %v213_v34 = vpop.f32.mrf.mxu1 }
  0x9f   :  { %v161_v30 = vadd.f32 %v160_v29, %v1533_v28  ;;  %v214_v35 = vadd.f32 %v213_v34, %v1533_v28 }
  0xa6   :  { %v162_v22 = vpop.f32.mrf.mxu0  ;;  %v215_v29 = vpop.f32.mrf.mxu1 }
  0xa7   :  { %v163_v23 = vadd.f32 %v162_v22, %v1533_v28 }
  0xa9   :  { %v246_v31 = vpop.f32.mrf.mxu2 }
  0xaa   :  { %v251_v32 = vadd.f32 %v246_v31, %v161_v30  ;;  %v216_v30 = vadd.f32 %v215_v29, %v1533_v28 }
  0xac   :  { %v1139_v33 = vmul.f32 -1.442695, %v251_v32 }
  0xae   :  { %1194 = vpow2.f32 %v1139_v33 }
  0xb1   :  { %v248_v36 = vpop.f32.mrf.mxu2 }
  0xb2   :  { %v252_v37 = vadd.f32 %v248_v36, %v214_v35 }
  0xb4   :  { %v1195_v38 = vpop.eup %1194  ;;  %v1140_v39 = vmul.f32 -1.442695, %v252_v37 }
  0xb5   :  { %v259_v40 = vadd.f32 1.0, %v1195_v38 }
  0xb6   :  { %1196 = vpow2.f32 %v1140_v39 }
  0xb7   :  { %1198 = vrcp.f32 %v259_v40  ;;  %v272_v46 = vand.u32 2147483648, %v259_v40  ;;  %v270_v48 = vand.u32 2147483647, %v259_v40  ;;  %vm266_vm5 = vweird.f32 %v259_v40 }
  0xb9   :  { %v273_v51 = vor.u32 1.1754944e-38, %v272_v46  ;;  %vm271_vm7 = vcmp.eq.f32.partialorder %v270_v48, 8.507059e+37 }
  0xbc   :  { %v1197_v41 = vpop.eup %1196 }
  0xbd   :  { %v1199_v42 = vpop.eup %1198  ;;  %v260_v43 = vadd.f32 1.0, %v1197_v41 }
  0xbe   :  { %v262_v44 = vmul.f32 %v1199_v42, %v259_v40  ;;  %vm267_vm4 = vweird.f32 %v1199_v42 }
  0xbf   :  { %1200 = vrcp.f32 %v260_v43  ;;  %vm268_vm6 = vmor %vm266_vm5, %vm267_vm4  ;;  %v287_v57 = vand.u32 2147483648, %v260_v43  ;;  %v285_v60 = vand.u32 2147483647, %v260_v43  ;;  %vm281_vm9 = vweird.f32 %v260_v43 }
  0xc0   :  { %v263_v45 = vsub.f32 1.0, %v262_v44 }
  0xc1   :  { %v288_v62 = vor.u32 1.1754944e-38, %v287_v57  ;;  %vm286_vm11 = vcmp.eq.f32.partialorder %v285_v60, 8.507059e+37 }
  0xc2   :  { %v264_v47 = vmul.f32 %v1199_v42, %v263_v45 }
  0xc4   :  { %v265_v49 = vadd.f32 %v1199_v42, %v264_v47 }
  0xc5   :  { %v1201_v50 = vpop.eup %1200 }
  0xc6   :  { %v277_v52 = vmul.f32 %v1201_v50, %v260_v43  ;;  %v269_v53 = vsel %vm268_vm6, %v1199_v42, %v265_v49  ;;  %vm282_vm8 = vweird.f32 %v1201_v50 }
  0xc7   :  { %v274_v54 = vsel %vm271_vm7, %v273_v51, %v269_v53  ;;  %vm283_vm10 = vmor %vm281_vm9, %vm282_vm8 }
  0xc8   :  { %v278_v55 = vsub.f32 1.0, %v277_v52  ;;  %v291_v56 = vmul.f32 2.0, %v274_v54  ;;  %v295_v7 = vmul.f32 0.0, %v274_v54 }
  0xca   :  { %v1141_v58 = vadd.f32 -1.0, %v291_v56  ;;  %v279_v59 = vmul.f32 %v1201_v50, %v278_v55 }
  0xcc   :  { %299 = vrot.lane.b32.xlu0 %v1141_v58, %s1426_s4  ;;  %v280_v61 = vadd.f32 %v1201_v50, %v279_v59 }
  0xce   :  { %v284_v63 = vsel %vm283_vm10, %v1201_v50, %v280_v61 }
  0xcf   :  { %v289_v0 = vsel %vm286_vm11, %v288_v62, %v284_v63 }
  0xd0   :  { %v292_v1 = vmul.f32 2.0, %v289_v0  ;;  %v296_v10 = vmul.f32 0.0, %v289_v0 }
  0xd2   :  { %v1142_v2 = vadd.f32 -1.0, %v292_v1 }
  0xd4   :  { %301 = vrot.lane.b32.xlu0 %v1142_v2, %s1426_s4 }
 0x13e   :  { %v300_v3 = vpop.permute.xlu0 %299 }
 0x13f   :  { %v305_v4 = vmul.f32 %v300_v3, %v274_v54 }
 0x141   :  { %309 = vrot.lane.b32.xlu1 %v305_v4, %s1427_s23 }
 0x146   :  { %v302_v5 = vpop.permute.xlu0 %301 }
 0x147   :  { %v306_v6 = vmul.f32 %v302_v5, %v289_v0 }
 0x149   :  { %311 = vrot.lane.b32.xlu1 %v306_v6, %s1427_s23 }
 0x1b3   :  { %v310_v8 = vpop.permute.xlu1 %309 }
 0x1b4   :  { %v1541_v9 = vadd.f32 %v310_v8, %v295_v7 }
 0x1b6   :  { %1202 = vtanh.f32 %v1541_v9 }
 0x1bb   :  { %v312_v11 = vpop.permute.xlu1 %311 }
 0x1bc   :  { %v1203_v12 = vpop.eup %1202  ;;  %v1544_v13 = vadd.f32 %v312_v11, %v296_v10 }
 0x1bd   :  { %321 = vrot.lane.b32.xlu2 %v1203_v12, %s1426_s4 }
 0x1be   :  { %1204 = vtanh.f32 %v1544_v13 }
 0x1c4   :  { %v1205_v14 = vpop.eup %1204 }
 0x1c5   :  { %323 = vrot.lane.b32.xlu2 %v1205_v14, %s1426_s4 }
 0x217   :  { %v322_v15 = vpop.permute.xlu2 %321 }
 0x218   :  { %v327_v17 = vmul.f32 %v322_v15, %v274_v54 }
 0x21f   :  { %v324_v16 = vpop.permute.xlu2 %323 }
 0x220   :  { %v328_v18 = vmul.f32 %v324_v16, %v289_v0  ;;  %v125_v16 = vld [vmem:[#allocation2 + $0x10] sm:$0xff] }
 0x222   :  { %v329_v19 = vpack.c.bf16 %v328_v18, %v327_v17  ;;  %v126_v17 = vld [vmem:[#allocation2 + $0x18] sm:$0xff]  ;;  %v182_v18 = vld [vmem:[#allocation5 + $0x10] sm:$0xff] }
 0x224   :  { %331 = vrot.lane.b32.xlu0 %v329_v19, %s1427_s23  ;;  %v132_v19 = vpack.c.bf16 %v126_v17, %v125_v16 }
 0x226   :  { %1132 = vmatmul.msk.bf16.gmra.mxu0 %vm138_vm3, %v132_v19 }
 0x296   :  { %v332_v20 = vpop.permute.xlu0 %331 }
 0x297   :  { %1143 = vmatmul.msk.bf16.vlgmr.msra.gmra.mxu3 %vm233_vm12, %v332_v20 }
 0x298   :  { %738 = vmatpush.bf16.msra.mxu3 %v1514_v21 }
 0x29c   :  { %739 = vmatpush.bf16.msra.mxu3 %v1516_v24 }
 0x31a   :  { %v345_v25 = vpop.f32.mrf.mxu3 }
 0x31b   :  { %v350_v26 = vadd.f32 %v345_v25, %v163_v23  ;;  %v165_v23 = vpop.f32.mrf.mxu0 }
 0x31c   :  { %v166_v25 = vadd.f32 %v165_v23, %v1533_v28 }
 0x31d   :  { %v1144_v27 = vmul.f32 -1.442695, %v350_v26 }
 0x31f   :  { %1206 = vpow2.f32 %v1144_v27 }
 0x322   :  { %v347_v31 = vpop.f32.mrf.mxu3 }
 0x323   :  { %v351_v32 = vadd.f32 %v347_v31, %v216_v30 }
 0x325   :  { %v1207_v33 = vpop.eup %1206  ;;  %v1145_v34 = vmul.f32 -1.442695, %v351_v32 }
 0x326   :  { %v358_v35 = vadd.f32 1.0, %v1207_v33 }
 0x327   :  { %1208 = vpow2.f32 %v1145_v34 }
 0x328   :  { %1210 = vrcp.f32 %v358_v35  ;;  %v371_v41 = vand.u32 2147483648, %v358_v35  ;;  %v369_v43 = vand.u32 2147483647, %v358_v35  ;;  %vm365_vm14 = vweird.f32 %v358_v35 }
 0x32a   :  { %v372_v46 = vor.u32 1.1754944e-38, %v371_v41  ;;  %vm370_vm0 = vcmp.eq.f32.partialorder %v369_v43, 8.507059e+37 }
 0x32d   :  { %v1209_v36 = vpop.eup %1208 }
 0x32e   :  { %v1211_v37 = vpop.eup %1210  ;;  %v359_v38 = vadd.f32 1.0, %v1209_v36 }
 0x32f   :  { %v361_v39 = vmul.f32 %v1211_v37, %v358_v35  ;;  %vm366_vm13 = vweird.f32 %v1211_v37 }
 0x330   :  { %1212 = vrcp.f32 %v359_v38  ;;  %vm367_vm15 = vmor %vm365_vm14, %vm366_vm13  ;;  %v386_v52 = vand.u32 2147483648, %v359_v38  ;;  %v384_v55 = vand.u32 2147483647, %v359_v38  ;;  %vm380_vm2 = vweird.f32 %v359_v38 }
 0x331   :  { %v362_v40 = vsub.f32 1.0, %v361_v39 }
 0x332   :  { %v387_v57 = vor.u32 1.1754944e-38, %v386_v52  ;;  %vm385_vm5 = vcmp.eq.f32.partialorder %v384_v55, 8.507059e+37 }
 0x333   :  { %v363_v42 = vmul.f32 %v1211_v37, %v362_v40 }
 0x335   :  { %v364_v44 = vadd.f32 %v1211_v37, %v363_v42 }
 0x336   :  { %v1213_v45 = vpop.eup %1212 }
 0x337   :  { %v376_v47 = vmul.f32 %v1213_v45, %v359_v38  ;;  %v368_v48 = vsel %vm367_vm15, %v1211_v37, %v364_v44  ;;  %vm381_vm1 = vweird.f32 %v1213_v45 }
 0x338   :  { %v373_v49 = vsel %vm370_vm0, %v372_v46, %v368_v48  ;;  %vm382_vm4 = vmor %vm380_vm2, %vm381_vm1 }
 0x339   :  { %v377_v50 = vsub.f32 1.0, %v376_v47  ;;  %v390_v51 = vmul.f32 2.0, %v373_v49  ;;  %v394_v6 = vmul.f32 %v373_v49, %v1541_v9  ;;  %v183_v9 = vld [vmem:[#allocation5 + $0x18] sm:$0xff] }
 0x33a   :  { %v189_v20 = vpack.c.bf16 %v183_v9, %v182_v18 }
 0x33b   :  { %v1146_v53 = vadd.f32 -1.0, %v390_v51  ;;  %v378_v54 = vmul.f32 %v1213_v45, %v377_v50 }
 0x33c   :  { %1136 = vmatmul.msk.bf16.gmra.mxu1 %vm138_vm3, %v189_v20 }
 0x33d   :  { %398 = vrot.lane.b32.xlu1 %v1146_v53, %s1426_s4  ;;  %v379_v56 = vadd.f32 %v1213_v45, %v378_v54 }
 0x33f   :  { %v383_v58 = vsel %vm382_vm4, %v1213_v45, %v379_v56 }
 0x340   :  { %v388_v59 = vsel %vm385_vm5, %v387_v57, %v383_v58 }
 0x341   :  { %v391_v60 = vmul.f32 2.0, %v388_v59  ;;  %v395_v2 = vmul.f32 %v388_v59, %v1544_v13 }
 0x343   :  { %v1147_v61 = vadd.f32 -1.0, %v391_v60 }
 0x345   :  { %400 = vrot.lane.b32.xlu2 %v1147_v61, %s1426_s4 }
 0x39f   :  { %v401_v62 = vpop.permute.xlu2 %400 }
 0x3a0   :  { %v405_v63 = vmul.f32 %v401_v62, %v388_v59 }
 0x3a2   :  { %410 = vrot.lane.b32.xlu1 %v405_v63, %s1427_s23 }
 0x3af   :  { %v399_v0 = vpop.permute.xlu1 %398 }
 0x3b0   :  { %v404_v1 = vmul.f32 %v399_v0, %v373_v49 }
 0x3b2   :  { %408 = vrot.lane.b32.xlu0 %v404_v1, %s1427_s23 }
 0x3b9   :  { %v218_v30 = vpop.f32.mrf.mxu1 }
 0x3ba   :  { %v219_v31 = vadd.f32 %v218_v30, %v1533_v28 }
 0x3c1   :  { %v220_v23 = vpop.f32.mrf.mxu1 }
 0x414   :  { %v411_v3 = vpop.permute.xlu1 %410 }
 0x415   :  { %v1560_v4 = vadd.f32 %v411_v3, %v395_v2 }
 0x417   :  { %1214 = vtanh.f32 %v1560_v4 }
 0x41d   :  { %v1215_v5 = vpop.eup %1214 }
 0x41e   :  { %422 = vrot.lane.b32.xlu0 %v1215_v5, %s1426_s4 }
 0x424   :  { %v409_v7 = vpop.permute.xlu0 %408 }
 0x425   :  { %v1565_v8 = vadd.f32 %v409_v7, %v394_v6 }
 0x427   :  { %1216 = vtanh.f32 %v1565_v8 }
 0x42d   :  { %v1217_v10 = vpop.eup %1216 }
 0x42e   :  { %420 = vrot.lane.b32.xlu2 %v1217_v10, %s1426_s4 }
 0x488   :  { %v421_v11 = vpop.permute.xlu2 %420 }
 0x489   :  { %v426_v13 = vmul.f32 %v421_v11, %v373_v49 }
 0x490   :  { %v423_v12 = vpop.permute.xlu0 %422 }
 0x491   :  { %v427_v14 = vmul.f32 %v423_v12, %v388_v59 }
 0x493   :  { %v428_v15 = vpack.c.bf16 %v427_v14, %v426_v13 }
 0x495   :  { %430 = vrot.lane.b32.xlu1 %v428_v15, %s1427_s23 }
 0x507   :  { %v431_v22 = vpop.permute.xlu1 %430 }
 0x508   :  { %1148 = vmatmul.msk.bf16.vlgmr.msrb.gmra.mxu2 %vm233_vm12, %v431_v22 }
 0x509   :  { %837 = vmatpush.bf16.msrb.mxu2 %v1514_v21 }
 0x50d   :  { %838 = vmatpush.bf16.msrb.mxu2 %v1516_v24 }
 0x58b   :  { %v444_v26 = vpop.f32.mrf.mxu2 }
 0x58c   :  { %v449_v27 = vadd.f32 %v444_v26, %v166_v25  ;;  %v221_v25 = vadd.f32 %v220_v23, %v1533_v28 }
 0x58e   :  { %v1149_v29 = vmul.f32 -1.442695, %v449_v27 }
 0x590   :  { %1218 = vpow2.f32 %v1149_v29 }
 0x593   :  { %v446_v32 = vpop.f32.mrf.mxu2 }
 0x594   :  { %v450_v33 = vadd.f32 %v446_v32, %v219_v31 }
 0x596   :  { %v1219_v34 = vpop.eup %1218  ;;  %v1150_v35 = vmul.f32 -1.442695, %v450_v33 }
 0x597   :  { %v457_v36 = vadd.f32 1.0, %v1219_v34 }
 0x598   :  { %1220 = vpow2.f32 %v1150_v35 }
 0x599   :  { %1222 = vrcp.f32 %v457_v36  ;;  %v470_v42 = vand.u32 2147483648, %v457_v36  ;;  %v468_v44 = vand.u32 2147483647, %v457_v36  ;;  %vm464_vm7 = vweird.f32 %v457_v36 }
 0x59b   :  { %v471_v47 = vor.u32 1.1754944e-38, %v470_v42  ;;  %vm469_vm9 = vcmp.eq.f32.partialorder %v468_v44, 8.507059e+37 }
 0x59e   :  { %v1221_v37 = vpop.eup %1220 }
 0x59f   :  { %v1223_v38 = vpop.eup %1222  ;;  %v458_v39 = vadd.f32 1.0, %v1221_v37 }
 0x5a0   :  { %v460_v40 = vmul.f32 %v1223_v38, %v457_v36  ;;  %vm465_vm6 = vweird.f32 %v1223_v38 }
 0x5a1   :  { %1224 = vrcp.f32 %v458_v39  ;;  %vm466_vm8 = vmor %vm464_vm7, %vm465_vm6  ;;  %v485_v53 = vand.u32 2147483648, %v458_v39  ;;  %v483_v56 = vand.u32 2147483647, %v458_v39  ;;  %vm479_vm11 = vweird.f32 %v458_v39 }
 0x5a2   :  { %v461_v41 = vsub.f32 1.0, %v460_v40 }
 0x5a3   :  { %v486_v58 = vor.u32 1.1754944e-38, %v485_v53  ;;  %vm484_vm14 = vcmp.eq.f32.partialorder %v483_v56, 8.507059e+37 }
 0x5a4   :  { %v462_v43 = vmul.f32 %v1223_v38, %v461_v41 }
 0x5a6   :  { %v463_v45 = vadd.f32 %v1223_v38, %v462_v43 }
 0x5a7   :  { %v1225_v46 = vpop.eup %1224 }
 0x5a8   :  { %v475_v48 = vmul.f32 %v1225_v46, %v458_v39  ;;  %v467_v49 = vsel %vm466_vm8, %v1223_v38, %v463_v45  ;;  %vm480_vm10 = vweird.f32 %v1225_v46 }
 0x5a9   :  { %v472_v50 = vsel %vm469_vm9, %v471_v47, %v467_v49  ;;  %vm481_vm13 = vmor %vm479_vm11, %vm480_vm10 }
 0x5aa   :  { %v476_v51 = vsub.f32 1.0, %v475_v48  ;;  %v489_v52 = vmul.f32 2.0, %v472_v50  ;;  %v493_v3 = vmul.f32 %v472_v50, %v1565_v8 }
 0x5ac   :  { %v1151_v54 = vadd.f32 -1.0, %v489_v52  ;;  %v477_v55 = vmul.f32 %v1225_v46, %v476_v51 }
 0x5ae   :  { %497 = vrot.lane.b32.xlu2 %v1151_v54, %s1426_s4  ;;  %v478_v57 = vadd.f32 %v1225_v46, %v477_v55 }
 0x5b0   :  { %v482_v59 = vsel %vm481_vm13, %v1225_v46, %v478_v57 }
 0x5b1   :  { %v487_v60 = vsel %vm484_vm14, %v486_v58, %v482_v59 }
 0x5b2   :  { %v490_v61 = vmul.f32 2.0, %v487_v60  ;;  %v494_v7 = vmul.f32 %v487_v60, %v1560_v4  ;;  %v167_v4 = vpop.f32.mrf.mxu0 }
 0x5b3   :  { %v168_v19 = vadd.f32 %v167_v4, %v1533_v28 }
 0x5b4   :  { %v1152_v62 = vadd.f32 -1.0, %v490_v61 }
 0x5b6   :  { %499 = vrot.lane.b32.xlu0 %v1152_v62, %s1426_s4 }
 0x608   :  { %v498_v63 = vpop.permute.xlu2 %497 }
 0x609   :  { %v503_v0 = vmul.f32 %v498_v63, %v472_v50 }
 0x60b   :  { %507 = vrot.lane.b32.xlu1 %v503_v0, %s1427_s23 }
 0x628   :  { %v500_v1 = vpop.permute.xlu0 %499 }
 0x629   :  { %v504_v2 = vmul.f32 %v500_v1, %v487_v60 }
 0x62b   :  { %509 = vrot.lane.b32.xlu2 %v504_v2, %s1427_s23 }
 0x67d   :  { %v508_v5 = vpop.permute.xlu1 %507 }
 0x67e   :  { %v1582_v6 = vadd.f32 %v508_v5, %v493_v3 }
 0x680   :  { %1226 = vtanh.f32 %v1582_v6 }
 0x685   :  { %v510_v10 = vpop.permute.xlu2 %509 }
 0x686   :  { %v1227_v11 = vpop.eup %1226  ;;  %v1586_v12 = vadd.f32 %v510_v10, %v494_v7 }
 0x687   :  { %519 = vrot.lane.b32.xlu0 %v1227_v11, %s1426_s4 }
 0x688   :  { %1228 = vtanh.f32 %v1586_v12 }
 0x68e   :  { %v1229_v13 = vpop.eup %1228 }
 0x68f   :  { %521 = vrot.lane.b32.xlu1 %v1229_v13, %s1426_s4  ;;  %v127_v13 = vld [vmem:[#allocation2 + $0x20] sm:$0xff] }
 0x6f9   :  { %v520_v14 = vpop.permute.xlu0 %519 }
 0x6fa   :  { %v525_v15 = vmul.f32 %v520_v14, %v472_v50  ;;  %v128_v14 = vld [vmem:[#allocation2 + $0x28] sm:$0xff] }
 0x701   :  { %v522_v8 = vpop.permute.xlu1 %521 }
 0x702   :  { %v526_v16 = vmul.f32 %v522_v8, %v487_v60  ;;  %v184_v8 = vld [vmem:[#allocation5 + $0x20] sm:$0xff] }
 0x704   :  { %v527_v17 = vpack.c.bf16 %v526_v16, %v525_v15  ;;  %v133_v15 = vpack.c.bf16 %v128_v14, %v127_v13 }
 0x706   :  { %529 = vrot.lane.b32.xlu2 %v527_v17, %s1427_s23  ;;  %1133 = vmatmul.msk.bf16.gmra.mxu0 %vm138_vm3, %v133_v15 }
 0x760   :  { %v530_v18 = vpop.permute.xlu2 %529 }
 0x761   :  { %1153 = vmatmul.msk.bf16.vlgmr.msrb.gmra.mxu3 %vm233_vm12, %v530_v18 }
 0x762   :  { %936 = vmatpush.bf16.msrb.mxu3 %v1514_v21 }
 0x766   :  { %937 = vmatpush.bf16.msrb.mxu3 %v1516_v24 }
 0x783   :  { %v170_v18 = vpop.f32.mrf.mxu0 }
 0x784   :  { %v171_v4 = vadd.f32 %v170_v18, %v1533_v28 }
 0x78b   :  { %v172_v14 = vpop.f32.mrf.mxu0 }
 0x7e4   :  { %v543_v9 = vpop.f32.mrf.mxu3 }
 0x7e5   :  { %v548_v20 = vadd.f32 %v543_v9, %v168_v19 }
 0x7e7   :  { %v1154_v22 = vmul.f32 -1.442695, %v548_v20 }
 0x7e9   :  { %1230 = vpow2.f32 %v1154_v22 }
 0x7ec   :  { %v545_v26 = vpop.f32.mrf.mxu3 }
 0x7ed   :  { %v549_v27 = vadd.f32 %v545_v26, %v221_v25 }
 0x7ef   :  { %v1231_v29 = vpop.eup %1230  ;;  %v1155_v30 = vmul.f32 -1.442695, %v549_v27 }
 0x7f0   :  { %v556_v31 = vadd.f32 1.0, %v1231_v29 }
 0x7f1   :  { %1232 = vpow2.f32 %v1155_v30 }
 0x7f2   :  { %1234 = vrcp.f32 %v556_v31  ;;  %v569_v35 = vand.u32 2147483648, %v556_v31  ;;  %v567_v37 = vand.u32 2147483647, %v556_v31  ;;  %vm563_vm0 = vweird.f32 %v556_v31 }
 0x7f4   :  { %v570_v40 = vor.u32 1.1754944e-38, %v569_v35  ;;  %vm568_vm2 = vcmp.eq.f32.partialorder %v567_v37, 8.507059e+37 }
 0x7f7   :  { %v1233_v21 = vpop.eup %1232 }
 0x7f8   :  { %v1235_v32 = vpop.eup %1234  ;;  %v557_v24 = vadd.f32 1.0, %v1233_v21 }
 0x7f9   :  { %v559_v33 = vmul.f32 %v1235_v32, %v556_v31  ;;  %vm564_vm15 = vweird.f32 %v1235_v32 }
 0x7fa   :  { %1236 = vrcp.f32 %v557_v24  ;;  %vm565_vm1 = vmor %vm563_vm0, %vm564_vm15  ;;  %v584_v46 = vand.u32 2147483648, %v557_v24  ;;  %v582_v49 = vand.u32 2147483647, %v557_v24  ;;  %vm578_vm5 = vweird.f32 %v557_v24 }
 0x7fb   :  { %v560_v34 = vsub.f32 1.0, %v559_v33 }
 0x7fc   :  { %v585_v51 = vor.u32 1.1754944e-38, %v584_v46  ;;  %vm583_vm7 = vcmp.eq.f32.partialorder %v582_v49, 8.507059e+37 }
 0x7fd   :  { %v561_v36 = vmul.f32 %v1235_v32, %v560_v34 }
 0x7ff   :  { %v562_v38 = vadd.f32 %v1235_v32, %v561_v36 }
 0x800   :  { %v1237_v39 = vpop.eup %1236 }
 0x801   :  { %v574_v41 = vmul.f32 %v1237_v39, %v557_v24  ;;  %v566_v42 = vsel %vm565_vm1, %v1235_v32, %v562_v38  ;;  %vm579_vm4 = vweird.f32 %v1237_v39 }
 0x802   :  { %v571_v43 = vsel %vm568_vm2, %v570_v40, %v566_v42  ;;  %vm580_vm6 = vmor %vm578_vm5, %vm579_vm4 }
 0x803   :  { %v575_v44 = vsub.f32 1.0, %v574_v41  ;;  %v588_v45 = vmul.f32 2.0, %v571_v43  ;;  %v592_v60 = vmul.f32 %v571_v43, %v1582_v6 }
 0x805   :  { %v1156_v47 = vadd.f32 -1.0, %v588_v45  ;;  %v576_v48 = vmul.f32 %v1237_v39, %v575_v44 }
 0x807   :  { %596 = vrot.lane.b32.xlu0 %v1156_v47, %s1426_s4  ;;  %v577_v50 = vadd.f32 %v1237_v39, %v576_v48 }
 0x809   :  { %v581_v52 = vsel %vm580_vm6, %v1237_v39, %v577_v50 }
 0x80a   :  { %v586_v53 = vsel %vm583_vm7, %v585_v51, %v581_v52 }
 0x80b   :  { %v589_v54 = vmul.f32 2.0, %v586_v53  ;;  %v593_v0 = vmul.f32 %v586_v53, %v1586_v12  ;;  %v185_v12 = vld [vmem:[#allocation5 + $0x28] sm:$0xff] }
 0x80c   :  { %v190_v16 = vpack.c.bf16 %v185_v12, %v184_v8 }
 0x80d   :  { %v1157_v55 = vadd.f32 -1.0, %v589_v54 }
 0x80e   :  { %1137 = vmatmul.msk.bf16.gmra.mxu1 %vm138_vm3, %v190_v16 }
 0x80f   :  { %598 = vrot.lane.b32.xlu1 %v1157_v55, %s1426_s4 }
 0x879   :  { %v597_v56 = vpop.permute.xlu0 %596 }
 0x87a   :  { %v602_v57 = vmul.f32 %v597_v56, %v571_v43 }
 0x87c   :  { %606 = vrot.lane.b32.xlu2 %v602_v57, %s1427_s23 }
 0x881   :  { %v599_v58 = vpop.permute.xlu1 %598 }
 0x882   :  { %v603_v59 = vmul.f32 %v599_v58, %v586_v53 }
 0x884   :  { %608 = vrot.lane.b32.xlu0 %v603_v59, %s1427_s23 }
 0x88b   :  { %v223_v22 = vpop.f32.mrf.mxu1 }
 0x88c   :  { %v224_v23 = vadd.f32 %v223_v22, %v1533_v28 }
 0x893   :  { %v225_v16 = vpop.f32.mrf.mxu1 }
 0x8d6   :  { %v607_v61 = vpop.permute.xlu2 %606 }
 0x8d7   :  { %v1602_v62 = vadd.f32 %v607_v61, %v592_v60 }
 0x8d9   :  { %1238 = vtanh.f32 %v1602_v62 }
 0x8df   :  { %v1239_v63 = vpop.eup %1238 }
 0x8e0   :  { %618 = vrot.lane.b32.xlu1 %v1239_v63, %s1426_s4 }
 0x8f6   :  { %v609_v1 = vpop.permute.xlu0 %608 }
 0x8f7   :  { %v1607_v2 = vadd.f32 %v609_v1, %v593_v0 }
 0x8f9   :  { %1240 = vtanh.f32 %v1607_v2 }
 0x8ff   :  { %v1241_v3 = vpop.eup %1240 }
 0x900   :  { %620 = vrot.lane.b32.xlu2 %v1241_v3, %s1426_s4 }
 0x952   :  { %v619_v5 = vpop.permute.xlu1 %618 }
 0x953   :  { %v624_v7 = vmul.f32 %v619_v5, %v571_v43 }
 0x95a   :  { %v621_v6 = vpop.permute.xlu2 %620 }
 0x95b   :  { %v625_v10 = vmul.f32 %v621_v6, %v586_v53 }
 0x95d   :  { %v626_v11 = vpack.c.bf16 %v625_v10, %v624_v7 }
 0x95f   :  { %628 = vrot.lane.b32.xlu0 %v626_v11, %s1427_s23 }
 0x9d1   :  { %v629_v17 = vpop.permute.xlu0 %628 }
 0x9d2   :  { %1158 = vmatmul.msk.bf16.vlgmr.msra.gmra.mxu2 %vm233_vm12, %v629_v17  ;;  %v226_v17 = vadd.f32 %v225_v16, %v1533_v28 }
 0xa55   :  { %v642_v19 = vpop.f32.mrf.mxu2 }
 0xa56   :  { %v647_v9 = vadd.f32 %v642_v19, %v171_v4 }
 0xa58   :  { %v1159_v20 = vmul.f32 -1.442695, %v647_v9 }
 0xa5a   :  { %1242 = vpow2.f32 %v1159_v20 }
 0xa5d   :  { %v644_v25 = vpop.f32.mrf.mxu2 }
 0xa5e   :  { %v648_v26 = vadd.f32 %v644_v25, %v224_v23 }
 0xa60   :  { %v1243_v27 = vpop.eup %1242  ;;  %v1160_v29 = vmul.f32 -1.442695, %v648_v26 }
 0xa61   :  { %v655_v30 = vadd.f32 1.0, %v1243_v27 }
 0xa62   :  { %1244 = vpow2.f32 %v1160_v29 }
 0xa63   :  { %1246 = vrcp.f32 %v655_v30  ;;  %v668_v34 = vand.u32 2147483648, %v655_v30  ;;  %v666_v36 = vand.u32 2147483647, %v655_v30  ;;  %vm662_vm9 = vweird.f32 %v655_v30 }
 0xa65   :  { %v669_v39 = vor.u32 1.1754944e-38, %v668_v34  ;;  %vm667_vm11 = vcmp.eq.f32.partialorder %v666_v36, 8.507059e+37 }
 0xa68   :  { %v1245_v31 = vpop.eup %1244 }
 0xa69   :  { %v1247_v21 = vpop.eup %1246  ;;  %v656_v32 = vadd.f32 1.0, %v1245_v31 }
 0xa6a   :  { %v658_v24 = vmul.f32 %v1247_v21, %v655_v30  ;;  %vm663_vm8 = vweird.f32 %v1247_v21 }
 0xa6b   :  { %1248 = vrcp.f32 %v656_v32  ;;  %vm664_vm10 = vmor %vm662_vm9, %vm663_vm8  ;;  %v683_v45 = vand.u32 2147483648, %v656_v32  ;;  %v681_v48 = vand.u32 2147483647, %v656_v32  ;;  %vm677_vm14 = vweird.f32 %v656_v32 }
 0xa6c   :  { %v659_v33 = vsub.f32 1.0, %v658_v24 }
 0xa6d   :  { %v684_v50 = vor.u32 1.1754944e-38, %v683_v45  ;;  %vm682_vm0 = vcmp.eq.f32.partialorder %v681_v48, 8.507059e+37 }
 0xa6e   :  { %v660_v35 = vmul.f32 %v1247_v21, %v659_v33 }
 0xa70   :  { %v661_v37 = vadd.f32 %v1247_v21, %v660_v35 }
 0xa71   :  { %v1249_v38 = vpop.eup %1248 }
 0xa72   :  { %v673_v40 = vmul.f32 %v1249_v38, %v656_v32  ;;  %v665_v41 = vsel %vm664_vm10, %v1247_v21, %v661_v37  ;;  %vm678_vm13 = vweird.f32 %v1249_v38 }
 0xa73   :  { %v670_v42 = vsel %vm667_vm11, %v669_v39, %v665_v41  ;;  %vm679_vm15 = vmor %vm677_vm14, %vm678_vm13 }
 0xa74   :  { %v674_v43 = vsub.f32 1.0, %v673_v40  ;;  %v687_v44 = vmul.f32 2.0, %v670_v42  ;;  %v691_v0 = vmul.f32 %v670_v42, %v1602_v62  ;;  %v173_v62 = vadd.f32 %v172_v14, %v1533_v28 }
 0xa76   :  { %v1161_v46 = vadd.f32 -1.0, %v687_v44  ;;  %v675_v47 = vmul.f32 %v1249_v38, %v674_v43 }
 0xa78   :  { %695 = vrot.lane.b32.xlu1 %v1161_v46, %s1426_s4  ;;  %v676_v49 = vadd.f32 %v1249_v38, %v675_v47 }
 0xa7a   :  { %v680_v51 = vsel %vm679_vm15, %v1249_v38, %v676_v49 }
 0xa7b   :  { %v685_v52 = vsel %vm682_vm0, %v684_v50, %v680_v51 }
 0xa7c   :  { %v688_v53 = vmul.f32 2.0, %v685_v52  ;;  %v692_v59 = vmul.f32 %v685_v52, %v1607_v2 }
 0xa7e   :  { %v1162_v54 = vadd.f32 -1.0, %v688_v53 }
 0xa80   :  { %697 = vrot.lane.b32.xlu2 %v1162_v54, %s1426_s4 }
 0xada   :  { %v698_v55 = vpop.permute.xlu2 %697 }
 0xadb   :  { %v702_v56 = vmul.f32 %v698_v55, %v685_v52 }
 0xadd   :  { %707 = vrot.lane.b32.xlu1 %v702_v56, %s1427_s23 }
 0xaea   :  { %v696_v57 = vpop.permute.xlu1 %695 }
 0xaeb   :  { %v701_v58 = vmul.f32 %v696_v57, %v670_v42 }
 0xaed   :  { %705 = vrot.lane.b32.xlu0 %v701_v58, %s1427_s23 }
 0xb4f   :  { %v708_v60 = vpop.permute.xlu1 %707 }
 0xb50   :  { %v1622_v61 = vadd.f32 %v708_v60, %v692_v59 }
 0xb52   :  { %1250 = vtanh.f32 %v1622_v61 }
 0xb58   :  { %v1251_v63 = vpop.eup %1250 }
 0xb59   :  { %719 = vrot.lane.b32.xlu0 %v1251_v63, %s1426_s4 }
 0xb5f   :  { %v706_v1 = vpop.permute.xlu0 %705 }
 0xb60   :  { %v1627_v3 = vadd.f32 %v706_v1, %v691_v0 }
 0xb62   :  { %1252 = vtanh.f32 %v1627_v3 }
 0xb68   :  { %v1253_v5 = vpop.eup %1252 }
 0xb69   :  { %717 = vrot.lane.b32.xlu2 %v1253_v5, %s1426_s4  ;;  %v129_v5 = vld [vmem:[#allocation2 + $0x30] sm:$0xff] }
 0xbc3   :  { %v718_v6 = vpop.permute.xlu2 %717 }
 0xbc4   :  { %v723_v7 = vmul.f32 %v718_v6, %v670_v42  ;;  %v186_v6 = vld [vmem:[#allocation5 + $0x30] sm:$0xff] }
 0xbcb   :  { %v720_v2 = vpop.permute.xlu0 %719 }
 0xbcc   :  { %v724_v10 = vmul.f32 %v720_v2, %v685_v52 }
 0xbce   :  { %v725_v11 = vpack.c.bf16 %v724_v10, %v723_v7  ;;  %v187_v7 = vld [vmem:[#allocation5 + $0x38] sm:$0xff] }
 0xbcf   :  { %v191_v10 = vpack.c.bf16 %v187_v7, %v186_v6 }
 0xbd0   :  { %727 = vrot.lane.b32.xlu1 %v725_v11, %s1427_s23 }
 0xbd1   :  { %1138 = vmatmul.msk.bf16.gmra.mxu1 %vm138_vm3, %v191_v10 }
 0xc42   :  { %v728_v13 = vpop.permute.xlu1 %727 }
 0xc43   :  { %1163 = vmatmul.msk.bf16.vlgmr.msra.gmra.mxu3 %vm233_vm12, %v728_v13 }
 0xcc6   :  { %v741_v8 = vpop.f32.mrf.mxu3 }
 0xcc7   :  { %v746_v15 = vadd.f32 %v741_v8, %v173_v62 }
 0xcc9   :  { %v1164_v12 = vmul.f32 -1.442695, %v746_v15 }
 0xccb   :  { %1254 = vpow2.f32 %v1164_v12  ;;  %v228_v12 = vpop.f32.mrf.mxu1 }
 0xccc   :  { %v229_v16 = vadd.f32 %v228_v12, %v1533_v28 }
 0xcce   :  { %v743_v18 = vpop.f32.mrf.mxu3 }
 0xccf   :  { %v747_v4 = vadd.f32 %v743_v18, %v226_v17 }
 0xcd1   :  { %v1255_v19 = vpop.eup %1254  ;;  %v1165_v9 = vmul.f32 -1.442695, %v747_v4 }
 0xcd2   :  { %v754_v20 = vadd.f32 1.0, %v1255_v19 }
 0xcd3   :  { %1256 = vpow2.f32 %v1165_v9  ;;  %v230_v10 = vpop.f32.mrf.mxu1 }
 0xcd4   :  { %1258 = vrcp.f32 %v754_v20  ;;  %v767_v29 = vand.u32 2147483648, %v754_v20  ;;  %v765_v31 = vand.u32 2147483647, %v754_v20  ;;  %vm761_vm2 = vweird.f32 %v754_v20 }
 0xcd6   :  { %v768_v24 = vor.u32 1.1754944e-38, %v767_v29  ;;  %vm766_vm5 = vcmp.eq.f32.partialorder %v765_v31, 8.507059e+37 }
 0xcd9   :  { %v1257_v22 = vpop.eup %1256 }
 0xcda   :  { %v1259_v23 = vpop.eup %1258  ;;  %v755_v25 = vadd.f32 1.0, %v1257_v22 }
 0xcdb   :  { %v757_v26 = vmul.f32 %v1259_v23, %v754_v20  ;;  %vm762_vm1 = vweird.f32 %v1259_v23 }
 0xcdc   :  { %1260 = vrcp.f32 %v755_v25  ;;  %vm763_vm4 = vmor %vm761_vm2, %vm762_vm1  ;;  %v782_v38 = vand.u32 2147483648, %v755_v25  ;;  %v780_v41 = vand.u32 2147483647, %v755_v25  ;;  %vm776_vm7 = vweird.f32 %v755_v25 }
 0xcdd   :  { %v758_v27 = vsub.f32 1.0, %v757_v26 }
 0xcde   :  { %v783_v43 = vor.u32 1.1754944e-38, %v782_v38  ;;  %vm781_vm9 = vcmp.eq.f32.partialorder %v780_v41, 8.507059e+37 }
 0xcdf   :  { %v759_v30 = vmul.f32 %v1259_v23, %v758_v27 }
 0xce1   :  { %v760_v21 = vadd.f32 %v1259_v23, %v759_v30 }
 0xce2   :  { %v1261_v32 = vpop.eup %1260 }
 0xce3   :  { %v772_v33 = vmul.f32 %v1261_v32, %v755_v25  ;;  %v764_v34 = vsel %vm763_vm4, %v1259_v23, %v760_v21  ;;  %vm777_vm6 = vweird.f32 %v1261_v32 }
 0xce4   :  { %v769_v35 = vsel %vm766_vm5, %v768_v24, %v764_v34  ;;  %vm778_vm8 = vmor %vm776_vm7, %vm777_vm6 }
 0xce5   :  { %v773_v36 = vsub.f32 1.0, %v772_v33  ;;  %v786_v37 = vmul.f32 2.0, %v769_v35  ;;  %v790_v52 = vmul.f32 %v769_v35, %v1627_v3 }
 0xce7   :  { %v1166_v39 = vadd.f32 -1.0, %v786_v37  ;;  %v774_v40 = vmul.f32 %v1261_v32, %v773_v36 }
 0xce9   :  { %794 = vrot.lane.b32.xlu2 %v1166_v39, %s1426_s4  ;;  %v775_v42 = vadd.f32 %v1261_v32, %v774_v40 }
 0xceb   :  { %v779_v44 = vsel %vm778_vm8, %v1261_v32, %v775_v42 }
 0xcec   :  { %v784_v45 = vsel %vm781_vm9, %v783_v43, %v779_v44 }
 0xced   :  { %v787_v46 = vmul.f32 2.0, %v784_v45  ;;  %v791_v55 = vmul.f32 %v784_v45, %v1622_v61  ;;  %v130_v61 = vld [vmem:[#allocation2 + $0x38] sm:$0xff] }
 0xcee   :  { %v134_v2 = vpack.c.bf16 %v130_v61, %v129_v5 }
 0xcef   :  { %v1167_v47 = vadd.f32 -1.0, %v787_v46 }
 0xcf0   :  { %1134 = vmatmul.msk.bf16.gmra.mxu0 %vm138_vm3, %v134_v2 }
 0xcf1   :  { %796 = vrot.lane.b32.xlu0 %v1167_v47, %s1426_s4 }
 0xd43   :  { %v795_v48 = vpop.permute.xlu2 %794 }
 0xd44   :  { %v800_v49 = vmul.f32 %v795_v48, %v769_v35 }
 0xd46   :  { %804 = vrot.lane.b32.xlu1 %v800_v49, %s1427_s23 }
 0xd63   :  { %v797_v50 = vpop.permute.xlu0 %796 }
 0xd64   :  { %v801_v51 = vmul.f32 %v797_v50, %v784_v45 }
 0xd66   :  { %806 = vrot.lane.b32.xlu2 %v801_v51, %s1427_s23 }
 0xd6d   :  { %v175_v13 = vpop.f32.mrf.mxu0 }
 0xd6e   :  { %v176_v14 = vadd.f32 %v175_v13, %v1533_v28 }
 0xd75   :  { %v177_v61 = vpop.f32.mrf.mxu0 }
 0xdb8   :  { %v805_v53 = vpop.permute.xlu1 %804 }
 0xdb9   :  { %v1640_v54 = vadd.f32 %v805_v53, %v790_v52 }
 0xdbb   :  { %1262 = vtanh.f32 %v1640_v54 }
 0xdc0   :  { %v807_v56 = vpop.permute.xlu2 %806 }
 0xdc1   :  { %v1263_v57 = vpop.eup %1262  ;;  %v1644_v58 = vadd.f32 %v807_v56, %v791_v55 }
 0xdc2   :  { %816 = vrot.lane.b32.xlu0 %v1263_v57, %s1426_s4 }
 0xdc3   :  { %1264 = vtanh.f32 %v1644_v58 }
 0xdc9   :  { %v1265_v59 = vpop.eup %1264 }
 0xdca   :  { %818 = vrot.lane.b32.xlu1 %v1265_v59, %s1426_s4 }
 0xe34   :  { %v817_v60 = vpop.permute.xlu0 %816 }
 0xe35   :  { %v822_v0 = vmul.f32 %v817_v60, %v769_v35 }
 0xe3c   :  { %v819_v63 = vpop.permute.xlu1 %818 }
 0xe3d   :  { %v823_v1 = vmul.f32 %v819_v63, %v784_v45 }
 0xe3f   :  { %v824_v3 = vpack.c.bf16 %v823_v1, %v822_v0 }
 0xe41   :  { %826 = vrot.lane.b32.xlu2 %v824_v3, %s1427_s23 }
 0xe9b   :  { %v827_v11 = vpop.permute.xlu2 %826 }
 0xe9c   :  { %1168 = vmatmul.msk.bf16.vlgmr.msrb.gmra.mxu2 %vm233_vm12, %v827_v11  ;;  %v231_v11 = vadd.f32 %v230_v10, %v1533_v28  ;;  %v1030_v10 = vld [vmem:[#allocation8] sm:$0xff] }
 0xf1f   :  { %v840_v62 = vpop.f32.mrf.mxu2 }
 0xf20   :  { %v845_v8 = vadd.f32 %v840_v62, %v176_v14 }
 0xf22   :  { %v1169_v15 = vmul.f32 -1.442695, %v845_v8 }
 0xf24   :  { %1266 = vpow2.f32 %v1169_v15 }
 0xf27   :  { %v842_v17 = vpop.f32.mrf.mxu2 }
 0xf28   :  { %v846_v18 = vadd.f32 %v842_v17, %v229_v16 }
 0xf2a   :  { %v1267_v4 = vpop.eup %1266  ;;  %v1170_v19 = vmul.f32 -1.442695, %v846_v18 }
 0xf2b   :  { %v853_v9 = vadd.f32 1.0, %v1267_v4 }
 0xf2c   :  { %1268 = vpow2.f32 %v1170_v19 }
 0xf2d   :  { %1270 = vrcp.f32 %v853_v9  ;;  %v866_v27 = vand.u32 2147483648, %v853_v9  ;;  %v864_v30 = vand.u32 2147483647, %v853_v9  ;;  %vm860_vm11 = vweird.f32 %v853_v9 }
 0xf2f   :  { %v867_v32 = vor.u32 1.1754944e-38, %v866_v27  ;;  %vm865_vm14 = vcmp.eq.f32.partialorder %v864_v30, 8.507059e+37 }
 0xf32   :  { %v1269_v20 = vpop.eup %1268 }
 0xf33   :  { %v1271_v22 = vpop.eup %1270  ;;  %v854_v23 = vadd.f32 1.0, %v1269_v20 }
 0xf34   :  { %v856_v25 = vmul.f32 %v1271_v22, %v853_v9  ;;  %vm861_vm10 = vweird.f32 %v1271_v22 }
 0xf35   :  { %1272 = vrcp.f32 %v854_v23  ;;  %vm862_vm13 = vmor %vm860_vm11, %vm861_vm10  ;;  %v881_v37 = vand.u32 2147483648, %v854_v23  ;;  %v879_v40 = vand.u32 2147483647, %v854_v23  ;;  %vm875_vm0 = vweird.f32 %v854_v23 }
 0xf36   :  { %v857_v26 = vsub.f32 1.0, %v856_v25 }
 0xf37   :  { %v882_v42 = vor.u32 1.1754944e-38, %v881_v37  ;;  %vm880_vm2 = vcmp.eq.f32.partialorder %v879_v40, 8.507059e+37 }
 0xf38   :  { %v858_v29 = vmul.f32 %v1271_v22, %v857_v26 }
 0xf3a   :  { %v859_v31 = vadd.f32 %v1271_v22, %v858_v29 }
 0xf3b   :  { %v1273_v21 = vpop.eup %1272 }
 0xf3c   :  { %v871_v24 = vmul.f32 %v1273_v21, %v854_v23  ;;  %v863_v33 = vsel %vm862_vm13, %v1271_v22, %v859_v31  ;;  %vm876_vm15 = vweird.f32 %v1273_v21 }
 0xf3d   :  { %v868_v34 = vsel %vm865_vm14, %v867_v32, %v863_v33  ;;  %vm877_vm1 = vmor %vm875_vm0, %vm876_vm15 }
 0xf3e   :  { %v872_v35 = vsub.f32 1.0, %v871_v24  ;;  %v885_v36 = vmul.f32 2.0, %v868_v34  ;;  %v889_v51 = vmul.f32 %v868_v34, %v1640_v54 }
 0xf40   :  { %v1171_v38 = vadd.f32 -1.0, %v885_v36  ;;  %v873_v39 = vmul.f32 %v1273_v21, %v872_v35 }
 0xf42   :  { %893 = vrot.lane.b32.xlu0 %v1171_v38, %s1426_s4  ;;  %v874_v41 = vadd.f32 %v1273_v21, %v873_v39 }
 0xf44   :  { %v878_v43 = vsel %vm877_vm1, %v1273_v21, %v874_v41 }
 0xf45   :  { %v883_v44 = vsel %vm880_vm2, %v882_v42, %v878_v43 }
 0xf46   :  { %v886_v45 = vmul.f32 2.0, %v883_v44  ;;  %v890_v56 = vmul.f32 %v883_v44, %v1644_v58  ;;  %v178_v58 = vadd.f32 %v177_v61, %v1533_v28 }
 0xf48   :  { %v1172_v46 = vadd.f32 -1.0, %v886_v45 }
 0xf4a   :  { %895 = vrot.lane.b32.xlu1 %v1172_v46, %s1426_s4 }
 0xfb4   :  { %v894_v47 = vpop.permute.xlu0 %893 }
 0xfb5   :  { %v899_v48 = vmul.f32 %v894_v47, %v868_v34 }
 0xfb7   :  { %903 = vrot.lane.b32.xlu2 %v899_v48, %s1427_s23 }
 0xfbc   :  { %v896_v49 = vpop.permute.xlu1 %895 }
 0xfbd   :  { %v900_v50 = vmul.f32 %v896_v49, %v883_v44 }
 0xfbf   :  { %905 = vrot.lane.b32.xlu0 %v900_v50, %s1427_s23 }
0x1011   :  { %v904_v52 = vpop.permute.xlu2 %903 }
0x1012   :  { %v1660_v53 = vadd.f32 %v904_v52, %v889_v51  ;;  %v1032_v51 = vld [vmem:[#allocation8 + $0x10] sm:$0xff]  ;;  %v1033_v52 = vld [vmem:[#allocation8 + $0x18] sm:$0xff] }
0x1014   :  { %1274 = vtanh.f32 %v1660_v53 }
0x101a   :  { %v1275_v55 = vpop.eup %1274 }
0x101b   :  { %915 = vrot.lane.b32.xlu1 %v1275_v55, %s1426_s4  ;;  %v1026_v55 = vld [vmem:[#allocation7 + $0x10] sm:$0xff] }
0x1031   :  { %v906_v57 = vpop.permute.xlu0 %905 }
0x1032   :  { %v1665_v59 = vadd.f32 %v906_v57, %v890_v56  ;;  %v1035_v56 = vpack.c.bf16 %v1033_v52, %v1032_v51  ;;  %v1027_v57 = vld [vmem:[#allocation7 + $0x18] sm:$0xff] }
0x1034   :  { %1276 = vtanh.f32 %v1665_v59  ;;  %1050 = vmatpush.bf16.msrb.mxu0 %v1035_v56 }
0x103a   :  { %v1277_v60 = vpop.eup %1276 }
0x103b   :  { %917 = vrot.lane.b32.xlu2 %v1277_v60, %s1426_s4  ;;  %v1025_v60 = vld [vmem:[#allocation7 + $0x8] sm:$0xff] }
0x108d   :  { %v916_v63 = vpop.permute.xlu1 %915 }
0x108e   :  { %v921_v0 = vmul.f32 %v916_v63, %v868_v34  ;;  %v1029_v63 = vpack.c.bf16 %v1027_v57, %v1026_v55 }
0x1090   :  { %1071 = vmatpush.bf16.msrb.mxu1 %v1029_v63 }
0x1095   :  { %v918_v54 = vpop.permute.xlu2 %917 }
0x1096   :  { %v922_v1 = vmul.f32 %v918_v54, %v883_v44 }
0x1098   :  { %v923_v3 = vpack.c.bf16 %v922_v1, %v921_v0 }
0x109a   :  { %925 = vrot.lane.b32.xlu0 %v923_v3, %s1427_s23 }
0x110c   :  { %v926_v5 = vpop.permute.xlu0 %925 }
0x110d   :  { %1173 = vmatmul.msk.bf16.vlgmr.msrb.gmra.mxu3 %vm233_vm12, %v926_v5 }
0x1190   :  { %v939_v6 = vpop.f32.mrf.mxu3 }
0x1191   :  { %v944_v2 = vadd.f32 %v939_v6, %v178_v58 }
0x1193   :  { %v1174_v7 = vmul.f32 -1.442695, %v944_v2 }
0x1195   :  { %1278 = vpow2.f32 %v1174_v7 }
0x1198   :  { %v941_v13 = vpop.f32.mrf.mxu3 }
0x1199   :  { %v945_v14 = vadd.f32 %v941_v13, %v231_v11  ;;  %v1031_v11 = vld [vmem:[#allocation8 + $0x8] sm:$0xff] }
0x119a   :  { %v1034_v13 = vpack.c.bf16 %v1031_v11, %v1030_v10 }
0x119b   :  { %v1279_v62 = vpop.eup %1278  ;;  %v1175_v8 = vmul.f32 -1.442695, %v945_v14 }
0x119c   :  { %v952_v15 = vadd.f32 1.0, %v1279_v62  ;;  %1051 = vmatpush.bf16.msrb.mxu0 %v1034_v13 }
0x119d   :  { %1280 = vpow2.f32 %v1175_v8  ;;  %v1087_v8 = vld [vmem:[%s1716_s8 + $0x10] sm:$0xff] }
0x119e   :  { %1282 = vrcp.f32 %v952_v15  ;;  %v965_v19 = vand.u32 2147483648, %v952_v15  ;;  %v963_v20 = vand.u32 2147483647, %v952_v15  ;;  %vm959_vm5 = vweird.f32 %v952_v15 }
0x11a0   :  { %v966_v23 = vor.u32 1.1754944e-38, %v965_v19  ;;  %vm964_vm7 = vcmp.eq.f32.partialorder %v963_v20, 8.507059e+37 }
0x11a3   :  { %v1281_v12 = vpop.eup %1280 }
0x11a4   :  { %v1283_v16 = vpop.eup %1282  ;;  %v953_v17 = vadd.f32 1.0, %v1281_v12 }
0x11a5   :  { %v955_v18 = vmul.f32 %v1283_v16, %v952_v15  ;;  %vm960_vm4 = vweird.f32 %v1283_v16  ;;  %v1088_v15 = vld [vmem:[%s1716_s8 + $0x18] sm:$0xff] }
0x11a6   :  { %1284 = vrcp.f32 %v953_v17  ;;  %vm961_vm6 = vmor %vm959_vm5, %vm960_vm4  ;;  %v980_v31 = vand.u32 2147483648, %v953_v17  ;;  %v978_v24 = vand.u32 2147483647, %v953_v17  ;;  %vm974_vm9 = vweird.f32 %v953_v17 }
0x11a7   :  { %v956_v4 = vsub.f32 1.0, %v955_v18  ;;  %v1090_v12 = vpack.c.bf16 %v1088_v15, %v1087_v8  ;;  %v1086_v18 = vld [vmem:[%s1716_s8 + $0x8] sm:$0xff] }
0x11a8   :  { %v981_v34 = vor.u32 1.1754944e-38, %v980_v31  ;;  %vm979_vm11 = vcmp.eq.f32.partialorder %v978_v24, 8.507059e+37 }
0x11a9   :  { %v957_v9 = vmul.f32 %v1283_v16, %v956_v4  ;;  %1104 = vmatpush.bf16.msra.mxu2 %v1090_v12 }
0x11ab   :  { %v958_v22 = vadd.f32 %v1283_v16, %v957_v9  ;;  %v1192_v9 = vld [vmem:[%s1715_s7] ss:$0 sm:$0xff] }
0x11ac   :  { %v1285_v28 = vpop.eup %1284 }
0x11ad   :  { %v970_v25 = vmul.f32 %v1285_v28, %v953_v17  ;;  %v962_v26 = vsel %vm961_vm6, %v1283_v16, %v958_v22  ;;  %vm975_vm8 = vweird.f32 %v1285_v28  ;;  %v1085_v17 = vld [vmem:[%s1716_s8] sm:$0xff]  ;;  %s1428_s8 = smov [#allocation10]  }
0x11ae   :  { %v967_v27 = vsel %vm964_vm7, %v966_v23, %v962_v26  ;;  %vm976_vm10 = vmor %vm974_vm9, %vm975_vm8  ;;  %v1089_v4 = vpack.c.bf16 %v1086_v18, %v1085_v17  ;;  %s1117_s6 = sshll.u32 %s1428_s8, 4  ;;  %s1118_s6 = int_to_ptr.vmem [resolvable:$true] %s1117_s6 }
0x11af   :  { %v971_v29 = vsub.f32 1.0, %v970_v25  ;;  %v984_v30 = vmul.f32 2.0, %v967_v27  ;;  %v988_v47 = vmul.f32 %v967_v27, %v1660_v53 }
0x11b0   :  { %1105 = vmatpush.bf16.msra.mxu2 %v1089_v4 }
0x11b1   :  { %v1176_v21 = vadd.f32 -1.0, %v984_v30  ;;  %v972_v32 = vmul.f32 %v1285_v28, %v971_v29 }
0x11b3   :  { %992 = vrot.lane.b32.xlu1 %v1176_v21, %s1426_s4  ;;  %v973_v33 = vadd.f32 %v1285_v28, %v972_v32 }
0x11b5   :  { %v977_v35 = vsel %vm976_vm10, %v1285_v28, %v973_v33 }
0x11b6   :  { %v982_v36 = vsel %vm979_vm11, %v981_v34, %v977_v35 }
0x11b7   :  { %v985_v37 = vmul.f32 2.0, %v982_v36  ;;  %v989_v43 = vmul.f32 %v982_v36, %v1665_v59  ;;  %v1024_v59 = vld [vmem:[#allocation7] sm:$0xff] }
0x11b8   :  { %v1028_v54 = vpack.c.bf16 %v1025_v60, %v1024_v59 }
0x11b9   :  { %v1177_v38 = vadd.f32 -1.0, %v985_v37 }
0x11ba   :  { %1072 = vmatpush.bf16.msrb.mxu1 %v1028_v54 }
0x11bb   :  { %994 = vrot.lane.b32.xlu2 %v1177_v38, %s1426_s4 }
0x1215   :  { %v995_v39 = vpop.permute.xlu2 %994 }
0x1216   :  { %v999_v40 = vmul.f32 %v995_v39, %v982_v36 }
0x1218   :  { %1004 = vrot.lane.b32.xlu1 %v999_v40, %s1427_s23 }
0x1225   :  { %v993_v41 = vpop.permute.xlu1 %992 }
0x1226   :  { %v998_v42 = vmul.f32 %v993_v41, %v967_v27 }
0x1228   :  { %1002 = vrot.lane.b32.xlu0 %v998_v42, %s1427_s23 }
0x128a   :  { %v1005_v44 = vpop.permute.xlu1 %1004 }
0x128b   :  { %v1009_v45 = vadd.f32 %v1005_v44, %v989_v43 }
0x128d   :  { %1286 = vtanh.f32 %v1009_v45 }
0x1293   :  { %v1287_v46 = vpop.eup %1286 }
0x1294   :  { %1016 = vrot.lane.b32.xlu0 %v1287_v46, %s1426_s4 }
0x129a   :  { %v1003_v48 = vpop.permute.xlu0 %1002 }
0x129b   :  { %v1008_v49 = vadd.f32 %v1003_v48, %v988_v47 }
0x129d   :  { %1288 = vtanh.f32 %v1008_v49 }
0x12a3   :  { %v1289_v50 = vpop.eup %1288 }
0x12a4   :  { %1014 = vrot.lane.b32.xlu2 %v1289_v50, %s1426_s4 }
0x12fe   :  { %v1015_v0 = vpop.permute.xlu2 %1014 }
0x12ff   :  { %v1020_v53 = vmul.f32 %v1015_v0, %v967_v27  ;;  %v1193_v27 = vld [vmem:[%s1717_s9] ss:$0 sm:$0xff] }
0x1301   :  { %v1022_v1 = vpack.c.bf16 %v1020_v53, %v1020_v53 }
0x1303   :  { %v1058_v3 = vunpack.c.l.b16 %v1022_v1 }
0x1305   :  { %v1059_v5 = vpack.c.b16 %v1058_v3, %v1058_v3 }
0x1306   :  { %v1017_v61 = vpop.permute.xlu0 %1016 }
0x1307   :  { %v1021_v58 = vmul.f32 %v1017_v61, %v982_v36  ;;  %1060 = vrot.lane.b32.xlu2 %v1059_v5, %s1427_s23 }
0x1309   :  { %v1023_v6 = vpack.c.bf16 %v1021_v58, %v1021_v58 }
0x130b   :  { %v1037_v2 = vunpack.c.l.b16 %v1023_v6 }
0x130d   :  { %v1038_v7 = vpack.c.b16 %v1037_v2, %v1037_v2 }
0x130f   :  { %1039 = vrot.lane.b32.xlu1 %v1038_v7, %s1427_s23 }
0x1361   :  { %v1061_v14 = vpop.permute.xlu2 %1060 }
0x1362   :  { %1179 = vmatmul.msk.bf16.vlgmr.msrb.gmra.mxu1 %vm233_vm12, %v1061_v14 }
0x1381   :  { %v1040_v62 = vpop.permute.xlu1 %1039 }
0x1382   :  { %1178 = vmatmul.msk.bf16.vlgmr.msrb.gmra.mxu0 %vm233_vm12, %v1040_v62 }
0x13df   :  { %v1074_v16 = vpop.f32.mrf.mxu1 }
0x13e7   :  { %v1076_v19 = vpop.f32.mrf.mxu1 }
0x13ff   :  { %v1053_v20 = vpop.f32.mrf.mxu0 }
0x1400   :  { %v1075_v22 = vadd.f32 %v1074_v16, %v1053_v20 }
0x1402   :  { %v1082_v28 = vadd.f32 %v1192_v9, %v1075_v22 }
0x1404   :  { %v1083_v23 = vmax.f32 %v1082_v28, 0.0 }
0x1406   :  { %v1084_v25 = vpack.c.bf16 %v1083_v23, %v1083_v23 }
0x1407   :  { %v1055_v26 = vpop.f32.mrf.mxu0 }
0x1408   :  { %1180 = vmatmul.msk.bf16.vlgmr.msra.gmra.mxu2 %vm233_vm12, %v1084_v25 }
0x148b   :  { %v1107_v29 = vpop.f32.mrf.mxu2 }
0x148c   :  { %v1108_v30 = vadd.f32 %v1193_v27, %v1107_v29 }
0x148e   :  { %1111 = vst.msk [vmem:[#allocation10] sm:$0xff] %vm138_vm3, %v1108_v30 }
0x148f   :  { %1122 = dma.vmem_to_hbm [thread:$0]  %s1118_s6, 128, %s1120_s15, [#allocation4]  }
0x1493   :  { %v1109_v31 = vpop.f32.mrf.mxu2 }
0x1494   :  { %1416 = dma.done.wait [#allocation4], 128  }
0x1495   :  { %1417 = vsyncadd [#allocation4], 4294967168 }
0x1496   :  { %1127 = vsyncpa [#allocation3], 1 }
0x1497   :  { %1128 = vsyncpa [#allocation6], 1 }
0x1498   :  { %1129 = vsyncpa [#allocation9], 1 }
0x1499   :  { %1130 = vsyncpa [#allocation4], 1 }

</bundles_post_ra>
